<compile_context>
chip_gen: v6e
topology: v6e:2x2x1
jax: 0.10.0
libtpu: 0.0.40
codegen_flags: <defaults>
</compile_context>

<pallas_src>
import functools

import jax
import jax.numpy as jnp
from jax.experimental import pallas as pl
from jax.experimental.pallas import tpu as pltpu


def _round_up(x, m):
    return ((x + m - 1) // m) * m


@functools.lru_cache(maxsize=1)
def _vmem_limit_bytes():
    # ~3/4 of physical VMEM, capped at 96 MiB (=> ~96 MiB on v5e/v6e, ~48 MiB
    # on v7x). Conservative fallback if the query is unavailable.
    try:
        cap = int(pltpu.get_tpu_info().vmem_capacity_bytes)
        return int(min(96 * 1024 * 1024, (cap * 3) // 4))
    except Exception:
        return 48 * 1024 * 1024


# -----------------------------------------------------------------------------
# Multi-head self-attention + residual + LayerNorm (+ fused seq-mask).
# grid = (bz [parallel], query tiles [parallel]); keys/values full-length.
# TODO(synk): for very long sequences also tile keys flash-attention style
#             (online softmax); full-length K/V is fine up to a few K tokens.
# -----------------------------------------------------------------------------
def _mha_kernel(xq_ref, xkv_ref, mask_ref, seq_ref,
                wq_ref, bq_ref, wk_ref, bk_ref, wv_ref, bv_ref,
                wo_ref, bo_ref, g_ref, beta_ref, o_ref, *, nb_heads):
    d_qk = wq_ref.shape[1]
    d_vh = wv_ref.shape[1]
    d_k = d_qk // nb_heads
    d_v = d_vh // nb_heads
    scale = 1.0 / (d_k ** 0.5)
    cdt = wq_ref.dtype                      # MXU compute dtype (native weights)

    xq = xq_ref[0]                          # (tq, d_model), query rows
    xkv = xkv_ref[0]                        # (L, d_model), key/value rows
    mask = mask_ref[0]                      # (1, L) float; >0.5 means "masked out"

    # QKV projections: native-dtype MXU inputs, f32 accumulation.
    # 1/sqrt(d_k) folded into q (one (tq, d_qk) multiply instead of per-head LxL).
    q = (jnp.dot(xq, wq_ref[...], preferred_element_type=jnp.float32)
         + bq_ref[...].astype(jnp.float32)) * scale
    k = jnp.dot(xkv, wk_ref[...], preferred_element_type=jnp.float32) \
        + bk_ref[...].astype(jnp.float32)
    v = jnp.dot(xkv, wv_ref[...], preferred_element_type=jnp.float32) \
        + bv_ref[...].astype(jnp.float32)
    q = q.astype(cdt)
    k = k.astype(cdt)
    v = v.astype(cdt)

    dn = (((1,), (1,)), ((), ()))           # contract last dims (no K transpose)
    heads = []
    for h in range(nb_heads):               # static unroll over heads
        qh = q[:, h * d_k:(h + 1) * d_k]
        kh = k[:, h * d_k:(h + 1) * d_k]
        vh = v[:, h * d_v:(h + 1) * d_v]
        s = jax.lax.dot_general(qh, kh, dn, preferred_element_type=jnp.float32)
        s = jnp.where(mask > 0.5, -1e9, s)                  # masked_fill semantics
        s = s - jnp.max(s, axis=-1, keepdims=True)
        e = jnp.exp(s)
        p = e * pl.reciprocal(jnp.sum(e, axis=-1, keepdims=True), approx=True)
        heads.append(jnp.dot(p.astype(cdt), vh,
                             preferred_element_type=jnp.float32).astype(cdt))
    # TODO(synk): training-mode attention/output Dropout omitted (eval identity).

    att = jnp.concatenate(heads, axis=-1)   # (tq, nb_heads*d_v)
    # Single output projection with the full d_vh contraction (fills the MXU).
    y = jnp.dot(att, wo_ref[...], preferred_element_type=jnp.float32) \
        + bo_ref[...].astype(jnp.float32) + xq.astype(jnp.float32)   # + residual

    mean = jnp.mean(y, axis=-1, keepdims=True)
    c = y - mean
    var = jnp.mean(c * c, axis=-1, keepdims=True)
    out = c * jax.lax.rsqrt(var + 1e-6) * g_ref[...].astype(jnp.float32) \
          + beta_ref[...].astype(jnp.float32)
    out = out * seq_ref[0].astype(jnp.float32)              # fused seq-mask
    o_ref[0] = out.astype(o_ref.dtype)


def multi_head_attention(x, wq, bq, wk, bk, wv, bv, wo, bo, gamma, beta,
                         *, nb_heads, att_mask=None, seq_mask=None, q_tile=256):
    """x: [bz, L, d_model] -> [bz, L, d_model].

    att_mask: optional [bz, L] bool/0-1 (True = masked key position).
    seq_mask: optional [bz, L, 1] float (multiplied into the output).
    """
    bz, L, d_model = x.shape
    d_qk = wq.shape[1]
    d_vh = wv.shape[1]
    dt = x.dtype

    # Tiny per-key mask (no [bz, L, L] materialization).
    if att_mask is None:
        mask = jnp.zeros((bz, 1, L), jnp.float32)
    else:
        mask = att_mask.astype(jnp.float32).reshape(bz, 1, L)
    if seq_mask is None:
        seq = jnp.ones((bz, L, 1), jnp.float32)
    else:
        seq = seq_mask.astype(jnp.float32).reshape(bz, L, 1)

    # Query tile: largest divisor of L that is <= q_tile and a multiple of 8;
    # fall back to the full sequence (full-extent blocks are always legal).
    tq = L
    if L > q_tile:
        cand = (q_tile // 8) * 8
        while cand >= 8:
            if L % cand == 0:
                tq = cand
                break
            cand -= 8
    n_q = L // tq

    bq2 = bq.reshape(1, d_qk)
    bk2 = bk.reshape(1, d_qk)
    bv2 = bv.reshape(1, d_vh)
    bo2 = bo.reshape(1, d_model)
    g2 = gamma.reshape(1, d_model)
    be2 = beta.reshape(1, d_model)

    itemsize = jnp.dtype(dt).itemsize
    w_item = jnp.dtype(wq.dtype).itemsize
    cost = pl.CostEstimate(
        flops=int(bz * (2 * L * d_model * d_qk                       # Q proj
                        + n_q * 2 * L * d_model * (d_qk + d_vh)      # K/V per q-tile
                        + 2 * L * L * (d_qk + d_vh)                  # scores + PV
                        + 2 * L * d_vh * d_model)),                  # out proj
        transcendentals=int(bz * nb_heads * L * L),
        bytes_accessed=int(bz * L * d_model * (2 + n_q) * itemsize   # xq + xkv + out
                           + bz * L * 4 * (n_q + 1)                  # att + seq masks
                           + (d_model * (2 * d_qk + d_vh) + d_vh * d_model
                              + 2 * d_qk + d_vh + 3 * d_model) * w_item))

    out = pl.pallas_call(
        functools.partial(_mha_kernel, nb_heads=nb_heads),
        out_shape=jax.ShapeDtypeStruct((bz, L, d_model), dt),
        grid_spec=pltpu.PrefetchScalarGridSpec(
            num_scalar_prefetch=0,
            grid=(bz, n_q),
            in_specs=[
                pl.BlockSpec((1, tq, d_model), lambda b, qi: (b, qi, 0)),  # x (q rows)
                pl.BlockSpec((1, L, d_model), lambda b, qi: (b, 0, 0)),    # x (k/v rows)
                pl.BlockSpec((1, 1, L), lambda b, qi: (b, 0, 0)),          # att mask
                pl.BlockSpec((1, tq, 1), lambda b, qi: (b, qi, 0)),        # seq mask
                pl.BlockSpec((d_model, d_qk), lambda b, qi: (0, 0)),       # Wq
                pl.BlockSpec((1, d_qk), lambda b, qi: (0, 0)),             # bq
                pl.BlockSpec((d_model, d_qk), lambda b, qi: (0, 0)),       # Wk
                pl.BlockSpec((1, d_qk), lambda b, qi: (0, 0)),             # bk
                pl.BlockSpec((d_model, d_vh), lambda b, qi: (0, 0)),       # Wv
                pl.BlockSpec((1, d_vh), lambda b, qi: (0, 0)),             # bv
                pl.BlockSpec((d_vh, d_model), lambda b, qi: (0, 0)),       # Wo
                pl.BlockSpec((1, d_model), lambda b, qi: (0, 0)),          # bo
                pl.BlockSpec((1, d_model), lambda b, qi: (0, 0)),          # gamma
                pl.BlockSpec((1, d_model), lambda b, qi: (0, 0)),          # beta
            ],
            out_specs=pl.BlockSpec((1, tq, d_model), lambda b, qi: (b, qi, 0)),
        ),
        compiler_params=pltpu.CompilerParams(
            dimension_semantics=("parallel", "parallel"),
            vmem_limit_bytes=_vmem_limit_bytes()),
        cost_estimate=cost,
    )(x, x, mask, seq, wq, bq2, wk, bk2, wv, bv2, wo, bo2, g2, be2)
    return out


# -----------------------------------------------------------------------------
# Positionwise feed-forward + residual + LayerNorm (+ fused seq-mask).
# grid = (row tiles [parallel], d_ff tiles [arbitrary, last]); f32 accumulator.
# -----------------------------------------------------------------------------
def _ffn_kernel(x_ref, seq_ref, w1_ref, b1_ref, w2_ref, b2_ref, g_ref, beta_ref,
                o_ref, acc_ref):
    kf = pl.program_id(1)
    nf = pl.num_programs(1)

    @pl.when(kf == 0)
    def _init():
        acc_ref[...] = jnp.zeros_like(acc_ref)

    x = x_ref[...]                                   # (TM, d_model), native dtype
    # Linear 1 (d_ff tile) + ReLU; native-dtype MXU inputs, f32 accumulation.
    h = jnp.dot(x, w1_ref[...], preferred_element_type=jnp.float32) \
        + b1_ref[...].astype(jnp.float32)
    h = jnp.maximum(h, 0.0)
    # TODO(synk): training-mode Dropout omitted (eval semantics = identity).

    # Partial Linear 2: accumulate this d_ff tile's contribution in f32 VMEM.
    acc_ref[...] += jnp.dot(h.astype(w2_ref.dtype), w2_ref[...],
                            preferred_element_type=jnp.float32)

    @pl.when(kf == nf - 1)
    def _finalize():
        # bias / residual / LayerNorm / seq-mask only once, after the reduction.
        y = acc_ref[...] + b2_ref[...].astype(jnp.float32) + x.astype(jnp.float32)
        mean = jnp.mean(y, axis=-1, keepdims=True)
        c = y - mean
        var = jnp.mean(c * c, axis=-1, keepdims=True)
        out = c * jax.lax.rsqrt(var + 1e-6) * g_ref[...].astype(jnp.float32) \
              + beta_ref[...].astype(jnp.float32)
        out = out * seq_ref[...].astype(jnp.float32)
        o_ref[...] = out.astype(o_ref.dtype)


def positionwise_ff(x, w1, b1, w2, b2, gamma, beta, *, seq_mask=None,
                    row_tile=512, ff_tile=512):
    """x: [bz, len_q, d_model] -> [bz, len_q, d_model]."""
    bz, len_q, d_model = x.shape
    d_ff = w1.shape[1]
    rows = bz * len_q
    dt = x.dtype
    itemsize = jnp.dtype(dt).itemsize
    w_item = jnp.dtype(w1.dtype).itemsize
    vmem_limit = _vmem_limit_bytes()

    # Sublane granule depends on dtype packing (f32:8, bf16:16, int8/fp8:32).
    sub = 8 if itemsize == 4 else (16 if itemsize == 2 else 32)
    tm = min(row_tile, _round_up(rows, sub))
    tm = _round_up(tm, sub)
    rows_p = _round_up(rows, tm)

    x2d = x.reshape(rows, d_model)
    if seq_mask is None:
        seq2d = jnp.ones((rows, 1), jnp.float32)
    else:
        seq2d = seq_mask.astype(jnp.float32).reshape(rows, 1)
    if rows_p != rows:
        x2d = jnp.pad(x2d, ((0, rows_p - rows), (0, 0)))
        seq2d = jnp.pad(seq2d, ((0, rows_p - rows), (0, 0)))

    # Keep the full W1/W2 resident (block index constant => fetched once for the
    # whole grid) whenever the double-buffered weights fit in ~half the VMEM
    # budget; otherwise stream lane-dense d_ff tiles on the reduction axis.
    # TODO(synk): on v7x, consider pipeline_mode=pl.Buffered(3) on the streamed
    #             W1/W2 blocks if xprof shows exposed DMA.
    w_resident_bytes = 4 * d_model * d_ff * w_item      # 2 weights x double buffer
    if d_ff <= ff_tile or w_resident_bytes <= vmem_limit // 2:
        tf = d_ff                                  # single tile == full dim (legal)
        d_ff_p = d_ff
        w1_p, b1_p, w2_p = w1, b1, w2
    else:
        tf = ff_tile                               # multiple of 128 (lane-dense)
        d_ff_p = _round_up(d_ff, tf)
        pad = d_ff_p - d_ff
        w1_p = jnp.pad(w1, ((0, 0), (0, pad)))
        b1_p = jnp.pad(b1, ((0, pad),))
        w2_p = jnp.pad(w2, ((0, pad), (0, 0)))
    nf = d_ff_p // tf
    n_row_tiles = rows_p // tm

    b1_2d = b1_p.reshape(1, d_ff_p)
    b2_2d = b2.reshape(1, d_model)
    g_2d = gamma.reshape(1, d_model)
    be_2d = beta.reshape(1, d_model)

    weight_streams = 1 if nf == 1 else n_row_tiles   # weights re-DMA'd per row tile
    cost = pl.CostEstimate(
        flops=int(4 * rows * d_model * d_ff),
        transcendentals=int(rows),
        bytes_accessed=int(2 * rows * d_model * itemsize + rows * 4
                           + weight_streams * 2 * d_model * d_ff * w_item
                           + (d_ff + 3 * d_model) * w_item))

    out2d = pl.pallas_call(
        _ffn_kernel,
        out_shape=jax.ShapeDtypeStruct((rows_p, d_model), dt),
        grid_spec=pltpu.PrefetchScalarGridSpec(
            num_scalar_prefetch=0,
            grid=(n_row_tiles, nf),
            in_specs=[
                pl.BlockSpec((tm, d_model), lambda i, kf: (i, 0)),    # x tile
                pl.BlockSpec((tm, 1), lambda i, kf: (i, 0)),          # seq mask tile
                pl.BlockSpec((d_model, tf), lambda i, kf: (0, kf)),   # W1 tile
                pl.BlockSpec((1, tf), lambda i, kf: (0, kf)),         # b1 tile
                pl.BlockSpec((tf, d_model), lambda i, kf: (kf, 0)),   # W2 tile
                pl.BlockSpec((1, d_model), lambda i, kf: (0, 0)),     # b2
                pl.BlockSpec((1, d_model), lambda i, kf: (0, 0)),     # gamma
                pl.BlockSpec((1, d_model), lambda i, kf: (0, 0)),     # beta
            ],
            out_specs=pl.BlockSpec((tm, d_model), lambda i, kf: (i, 0)),
            scratch_shapes=[pltpu.VMEM((tm, d_model), jnp.float32)],
        ),
        compiler_params=pltpu.CompilerParams(
            dimension_semantics=("parallel", "arbitrary"),
            vmem_limit_bytes=vmem_limit),
        cost_estimate=cost,
    )(x2d, seq2d, w1_p, b1_2d, w2_p, b2_2d, g_2d, be_2d)

    return out2d[:rows].reshape(bz, len_q, d_model)


# -----------------------------------------------------------------------------
# Full EncoderLayer forward (eval mode). seq_mask is fused into both kernels.
# -----------------------------------------------------------------------------
def encoder_layer(x, p, att_mask=None, seq_mask=None):
    mh = multi_head_attention(
        x, p["wq"], p["bq"], p["wk"], p["bk"], p["wv"], p["bv"],
        p["wo"], p["bo"], p["ln1_g"], p["ln1_b"],
        nb_heads=p["nb_heads"], att_mask=att_mask, seq_mask=seq_mask)
    out = positionwise_ff(mh, p["w1"], p["b1"], p["w2"], p["b2"],
                          p["ln2_g"], p["ln2_b"], seq_mask=seq_mask)
    return out


# -----------------------------------------------------------------------------
# Pure-JAX reference (eval mode), for validation.
# -----------------------------------------------------------------------------
def _layer_norm_ref(y, g, b, eps=1e-6):
    mean = jnp.mean(y, axis=-1, keepdims=True)
    c = y - mean
    var = jnp.mean(c * c, axis=-1, keepdims=True)
    return c * jax.lax.rsqrt(var + eps) * g + b


def _ref_encoder_layer(x, p, att_mask=None, seq_mask=None):
    bz, L, dm = x.shape
    nh = p["nb_heads"]
    dk = p["wq"].shape[1] // nh
    dv = p["wv"].shape[1] // nh
    q = (x @ p["wq"] + p["bq"]).reshape(bz, L, nh, dk).transpose(0, 2, 1, 3)
    k = (x @ p["wk"] + p["bk"]).reshape(bz, L, nh, dk).transpose(0, 2, 1, 3)
    v = (x @ p["wv"] + p["bv"]).reshape(bz, L, nh, dv).transpose(0, 2, 1, 3)
    s = jnp.einsum("bhqd,bhkd->bhqk", q, k) * (1.0 / dk ** 0.5)
    if att_mask is not None:
        s = jnp.where(att_mask[:, None, None, :], -1e9, s)
    pmat = jax.nn.softmax(s, axis=-1)
    att = jnp.einsum("bhqk,bhkd->bhqd", pmat, v).transpose(0, 2, 1, 3).reshape(bz, L, nh * dv)
    mh = _layer_norm_ref(att @ p["wo"] + p["bo"] + x, p["ln1_g"], p["ln1_b"])
    if seq_mask is not None:
        mh = mh * seq_mask
    h = jnp.maximum(mh @ p["w1"] + p["b1"], 0.0)
    out = _layer_norm_ref(h @ p["w2"] + p["b2"] + mh, p["ln2_g"], p["ln2_b"])
    if seq_mask is not None:
        out = out * seq_mask
    return out


if __name__ == "__main__":
    key = jax.random.PRNGKey(0)
    bz, L, d_model, nb_heads, d_k, d_v, d_ff = 2, 8, 32, 4, 8, 8, 64
    ks = jax.random.split(key, 18)

    def w(kk, i, o, s=0.1):
        return jax.random.normal(kk, (i, o), dtype=jnp.float32) * s

    def b(kk, n, s=0.01):
        return jax.random.normal(kk, (n,), dtype=jnp.float32) * s

    x = jax.random.normal(ks[0], (bz, L, d_model), dtype=jnp.float32)
    params = dict(
        nb_heads=nb_heads,
        wq=w(ks[1], d_model, d_k * nb_heads), bq=b(ks[2], d_k * nb_heads),
        wk=w(ks[3], d_model, d_k * nb_heads), bk=b(ks[4], d_k * nb_heads),
        wv=w(ks[5], d_model, d_v * nb_heads), bv=b(ks[6], d_v * nb_heads),
        wo=w(ks[7], d_v * nb_heads, d_model), bo=b(ks[8], d_model),
        ln1_g=1.0 + 0.1 * jax.random.normal(ks[9], (d_model,), dtype=jnp.float32),
        ln1_b=b(ks[10], d_model),
        w1=w(ks[11], d_model, d_ff), b1=b(ks[12], d_ff),
        w2=w(ks[13], d_ff, d_model), b2=b(ks[14], d_model),
        ln2_g=1.0 + 0.1 * jax.random.normal(ks[15], (d_model,), dtype=jnp.float32),
        ln2_b=b(ks[16], d_model),
    )
    # Mask the last two key positions; zero out the last sequence position.
    att_mask = jnp.zeros((bz, L), dtype=bool).at[:, -2:].set(True)
    seq_mask = jnp.ones((bz, L, 1), dtype=jnp.float32).at[:, -1, :].set(0.0)

    out = encoder_layer(x, params, att_mask=att_mask, seq_mask=seq_mask)
    out = jax.block_until_ready(out)

    ref = _ref_encoder_layer(x, params, att_mask=att_mask, seq_mask=seq_mask)
    assert out.shape == (bz, L, d_model)
    # approx=True softmax reciprocal -> slightly looser tolerance than pure-f32.
    assert jnp.allclose(out, ref, atol=2e-3, rtol=2e-3), "mismatch vs reference"

    print("KERNEL_OK")
</pallas_src>

<mosaic_0001>
module attributes {stable_mosaic.version = 11 : i64} {
  func.func @_mha_kernel(%arg0: i32, %arg1: i32, %arg2: memref<1x8x32xf32, #tpu.memory_space<vmem>>, %arg3: memref<1x8x32xf32, #tpu.memory_space<vmem>>, %arg4: memref<1x1x8xf32, #tpu.memory_space<vmem>>, %arg5: memref<1x8x1xf32, #tpu.memory_space<vmem>>, %arg6: memref<32x32xf32, #tpu.memory_space<vmem>>, %arg7: memref<1x32xf32, #tpu.memory_space<vmem>>, %arg8: memref<32x32xf32, #tpu.memory_space<vmem>>, %arg9: memref<1x32xf32, #tpu.memory_space<vmem>>, %arg10: memref<32x32xf32, #tpu.memory_space<vmem>>, %arg11: memref<1x32xf32, #tpu.memory_space<vmem>>, %arg12: memref<32x32xf32, #tpu.memory_space<vmem>>, %arg13: memref<1x32xf32, #tpu.memory_space<vmem>>, %arg14: memref<1x32xf32, #tpu.memory_space<vmem>>, %arg15: memref<1x32xf32, #tpu.memory_space<vmem>>, %arg16: memref<1x8x32xf32, #tpu.memory_space<vmem>>) attributes {dimension_semantics = [#tpu.dimension_semantics<parallel>, #tpu.dimension_semantics<parallel>], iteration_bounds = array<i64: 2, 1>, scalar_prefetch = 0 : i64, scratch_operands = 0 : i64, tpu.core_type = #tpu.core_type<tc>, window_params = [{transform_indices = @transform_0, window_bounds = array<i64: 1, 8, 32>}, {transform_indices = @transform_1, window_bounds = array<i64: 1, 8, 32>}, {transform_indices = @transform_2, window_bounds = array<i64: 1, 1, 8>}, {transform_indices = @transform_3, window_bounds = array<i64: 1, 8, 1>}, {pipeline_mode = #tpu.pipeline_mode<synchronous>, transform_indices = @transform_4, window_bounds = array<i64: 32, 32>}, {pipeline_mode = #tpu.pipeline_mode<synchronous>, transform_indices = @transform_5, window_bounds = array<i64: 1, 32>}, {pipeline_mode = #tpu.pipeline_mode<synchronous>, transform_indices = @transform_6, window_bounds = array<i64: 32, 32>}, {pipeline_mode = #tpu.pipeline_mode<synchronous>, transform_indices = @transform_7, window_bounds = array<i64: 1, 32>}, {pipeline_mode = #tpu.pipeline_mode<synchronous>, transform_indices = @transform_8, window_bounds = array<i64: 32, 32>}, {pipeline_mode = #tpu.pipeline_mode<synchronous>, transform_indices = @transform_9, window_bounds = array<i64: 1, 32>}, {pipeline_mode = #tpu.pipeline_mode<synchronous>, transform_indices = @transform_10, window_bounds = array<i64: 32, 32>}, {pipeline_mode = #tpu.pipeline_mode<synchronous>, transform_indices = @transform_11, window_bounds = array<i64: 1, 32>}, {pipeline_mode = #tpu.pipeline_mode<synchronous>, transform_indices = @transform_12, window_bounds = array<i64: 1, 32>}, {pipeline_mode = #tpu.pipeline_mode<synchronous>, transform_indices = @transform_13, window_bounds = array<i64: 1, 32>}, {transform_indices = @transform_14, window_bounds = array<i64: 1, 8, 32>}]} {
    %c0 = arith.constant 0 : index
    %c0_0 = arith.constant 0 : index
    %c0_1 = arith.constant 0 : index
    %0 = vector.load %arg2[%c0, %c0_0, %c0_1] : memref<1x8x32xf32, #tpu.memory_space<vmem>>, vector<1x8x32xf32>
    %1 = vector.shape_cast %0 : vector<1x8x32xf32> to vector<8x32xf32>
    %c0_2 = arith.constant 0 : index
    %c0_3 = arith.constant 0 : index
    %c0_4 = arith.constant 0 : index
    %2 = vector.load %arg3[%c0_2, %c0_3, %c0_4] : memref<1x8x32xf32, #tpu.memory_space<vmem>>, vector<1x8x32xf32>
    %3 = vector.shape_cast %2 : vector<1x8x32xf32> to vector<8x32xf32>
    %c0_5 = arith.constant 0 : index
    %c0_6 = arith.constant 0 : index
    %c0_7 = arith.constant 0 : index
    %4 = vector.load %arg4[%c0_5, %c0_6, %c0_7] : memref<1x1x8xf32, #tpu.memory_space<vmem>>, vector<1x1x8xf32>
    %5 = vector.shape_cast %4 : vector<1x1x8xf32> to vector<1x8xf32>
    %c0_8 = arith.constant 0 : index
    %c0_9 = arith.constant 0 : index
    %6 = vector.load %arg6[%c0_8, %c0_9] : memref<32x32xf32, #tpu.memory_space<vmem>>, vector<32x32xf32>
    %cst = arith.constant dense<0.000000e+00> : vector<8x32xf32>
    %7 = tpu.matmul %1, %6, %cst {dimension_numbers = #tpu.dot_dimension_numbers<[1], [0], [0], [1], [0, 0, 1, 1], [], []>} : vector<8x32xf32>, vector<32x32xf32>, vector<8x32xf32> -> vector<8x32xf32>
    %c0_10 = arith.constant 0 : index
    %c0_11 = arith.constant 0 : index
    %8 = vector.load %arg7[%c0_10, %c0_11] : memref<1x32xf32, #tpu.memory_space<vmem>>, vector<1x32xf32>
    %9 = vector.broadcast %8 : vector<1x32xf32> to vector<8x32xf32>
    %10 = arith.addf %7, %9 : vector<8x32xf32>
    %cst_12 = arith.constant 0.353553385 : f32
    %11 = vector.broadcast %cst_12 : f32 to vector<8x32xf32>
    %12 = arith.mulf %10, %11 : vector<8x32xf32>
    %c0_13 = arith.constant 0 : index
    %c0_14 = arith.constant 0 : index
    %13 = vector.load %arg8[%c0_13, %c0_14] : memref<32x32xf32, #tpu.memory_space<vmem>>, vector<32x32xf32>
    %cst_15 = arith.constant dense<0.000000e+00> : vector<8x32xf32>
    %14 = tpu.matmul %3, %13, %cst_15 {dimension_numbers = #tpu.dot_dimension_numbers<[1], [0], [0], [1], [0, 0, 1, 1], [], []>} : vector<8x32xf32>, vector<32x32xf32>, vector<8x32xf32> -> vector<8x32xf32>
    %c0_16 = arith.constant 0 : index
    %c0_17 = arith.constant 0 : index
    %15 = vector.load %arg9[%c0_16, %c0_17] : memref<1x32xf32, #tpu.memory_space<vmem>>, vector<1x32xf32>
    %16 = vector.broadcast %15 : vector<1x32xf32> to vector<8x32xf32>
    %17 = arith.addf %14, %16 : vector<8x32xf32>
    %c0_18 = arith.constant 0 : index
    %c0_19 = arith.constant 0 : index
    %18 = vector.load %arg10[%c0_18, %c0_19] : memref<32x32xf32, #tpu.memory_space<vmem>>, vector<32x32xf32>
    %cst_20 = arith.constant dense<0.000000e+00> : vector<8x32xf32>
    %19 = tpu.matmul %3, %18, %cst_20 {dimension_numbers = #tpu.dot_dimension_numbers<[1], [0], [0], [1], [0, 0, 1, 1], [], []>} : vector<8x32xf32>, vector<32x32xf32>, vector<8x32xf32> -> vector<8x32xf32>
    %c0_21 = arith.constant 0 : index
    %c0_22 = arith.constant 0 : index
    %20 = vector.load %arg11[%c0_21, %c0_22] : memref<1x32xf32, #tpu.memory_space<vmem>>, vector<1x32xf32>
    %21 = vector.broadcast %20 : vector<1x32xf32> to vector<8x32xf32>
    %22 = arith.addf %19, %21 : vector<8x32xf32>
    %23 = vector.extract_strided_slice %12 {offsets = [0, 0], sizes = [8, 8], strides = [1, 1]} : vector<8x32xf32> to vector<8x8xf32>
    %24 = vector.extract_strided_slice %17 {offsets = [0, 0], sizes = [8, 8], strides = [1, 1]} : vector<8x32xf32> to vector<8x8xf32>
    %25 = vector.extract_strided_slice %22 {offsets = [0, 0], sizes = [8, 8], strides = [1, 1]} : vector<8x32xf32> to vector<8x8xf32>
    %cst_23 = arith.constant dense<0.000000e+00> : vector<8x8xf32>
    %26 = tpu.matmul %23, %24, %cst_23 {dimension_numbers = #tpu.dot_dimension_numbers<[1], [1], [0], [0], [0, 0, 1, 0], [], []>} : vector<8x8xf32>, vector<8x8xf32>, vector<8x8xf32> -> vector<8x8xf32>
    %cst_24 = arith.constant 5.000000e-01 : f32
    %27 = vector.broadcast %cst_24 : f32 to vector<1x8xf32>
    %28 = arith.cmpf ogt, %5, %27 : vector<1x8xf32>
    %cst_25 = arith.constant -1.000000e+09 : f32
    %29 = vector.shape_cast %28 : vector<1x8xi1> to vector<1x8xi1>
    %30 = vector.broadcast %29 : vector<1x8xi1> to vector<8x8xi1>
    %31 = vector.broadcast %cst_25 : f32 to vector<8x8xf32>
    %32 = arith.select %30, %31, %26 : vector<8x8xi1>, vector<8x8xf32>
    %cst_26 = arith.constant dense<0xFF800000> : vector<8xf32>
    %33 = vector.multi_reduction <maximumf>, %32, %cst_26 [1] : vector<8x8xf32> to vector<8xf32>
    %34 = vector.shape_cast %33 : vector<8xf32> to vector<8x1xf32>
    %35 = vector.broadcast %34 : vector<8x1xf32> to vector<8x8xf32>
    %36 = arith.subf %32, %35 : vector<8x8xf32>
    %37 = math.exp %36 : vector<8x8xf32>
    %cst_27 = arith.constant dense<0.000000e+00> : vector<8xf32>
    %38 = vector.multi_reduction <add>, %37, %cst_27 [1] : vector<8x8xf32> to vector<8xf32>
    %39 = vector.shape_cast %38 : vector<8xf32> to vector<8x1xf32>
    %40 = tpu.reciprocal %39 {approx = true} : vector<8x1xf32> -> vector<8x1xf32>
    %41 = vector.broadcast %40 : vector<8x1xf32> to vector<8x8xf32>
    %42 = arith.mulf %37, %41 : vector<8x8xf32>
    %cst_28 = arith.constant dense<0.000000e+00> : vector<8x8xf32>
    %43 = tpu.matmul %42, %25, %cst_28 {dimension_numbers = #tpu.dot_dimension_numbers<[1], [0], [0], [1], [0, 0, 1, 1], [], []>} : vector<8x8xf32>, vector<8x8xf32>, vector<8x8xf32> -> vector<8x8xf32>
    %44 = vector.extract_strided_slice %12 {offsets = [0, 8], sizes = [8, 8], strides = [1, 1]} : vector<8x32xf32> to vector<8x8xf32>
    %45 = vector.extract_strided_slice %17 {offsets = [0, 8], sizes = [8, 8], strides = [1, 1]} : vector<8x32xf32> to vector<8x8xf32>
    %46 = vector.extract_strided_slice %22 {offsets = [0, 8], sizes = [8, 8], strides = [1, 1]} : vector<8x32xf32> to vector<8x8xf32>
    %cst_29 = arith.constant dense<0.000000e+00> : vector<8x8xf32>
    %47 = tpu.matmul %44, %45, %cst_29 {dimension_numbers = #tpu.dot_dimension_numbers<[1], [1], [0], [0], [0, 0, 1, 0], [], []>} : vector<8x8xf32>, vector<8x8xf32>, vector<8x8xf32> -> vector<8x8xf32>
    %cst_30 = arith.constant 5.000000e-01 : f32
    %48 = vector.broadcast %cst_30 : f32 to vector<1x8xf32>
    %49 = arith.cmpf ogt, %5, %48 : vector<1x8xf32>
    %cst_31 = arith.constant -1.000000e+09 : f32
    %50 = vector.shape_cast %49 : vector<1x8xi1> to vector<1x8xi1>
    %51 = vector.broadcast %50 : vector<1x8xi1> to vector<8x8xi1>
    %52 = vector.broadcast %cst_31 : f32 to vector<8x8xf32>
    %53 = arith.select %51, %52, %47 : vector<8x8xi1>, vector<8x8xf32>
    %cst_32 = arith.constant dense<0xFF800000> : vector<8xf32>
    %54 = vector.multi_reduction <maximumf>, %53, %cst_32 [1] : vector<8x8xf32> to vector<8xf32>
    %55 = vector.shape_cast %54 : vector<8xf32> to vector<8x1xf32>
    %56 = vector.broadcast %55 : vector<8x1xf32> to vector<8x8xf32>
    %57 = arith.subf %53, %56 : vector<8x8xf32>
    %58 = math.exp %57 : vector<8x8xf32>
    %cst_33 = arith.constant dense<0.000000e+00> : vector<8xf32>
    %59 = vector.multi_reduction <add>, %58, %cst_33 [1] : vector<8x8xf32> to vector<8xf32>
    %60 = vector.shape_cast %59 : vector<8xf32> to vector<8x1xf32>
    %61 = tpu.reciprocal %60 {approx = true} : vector<8x1xf32> -> vector<8x1xf32>
    %62 = vector.broadcast %61 : vector<8x1xf32> to vector<8x8xf32>
    %63 = arith.mulf %58, %62 : vector<8x8xf32>
    %cst_34 = arith.constant dense<0.000000e+00> : vector<8x8xf32>
    %64 = tpu.matmul %63, %46, %cst_34 {dimension_numbers = #tpu.dot_dimension_numbers<[1], [0], [0], [1], [0, 0, 1, 1], [], []>} : vector<8x8xf32>, vector<8x8xf32>, vector<8x8xf32> -> vector<8x8xf32>
    %65 = vector.extract_strided_slice %12 {offsets = [0, 16], sizes = [8, 8], strides = [1, 1]} : vector<8x32xf32> to vector<8x8xf32>
    %66 = vector.extract_strided_slice %17 {offsets = [0, 16], sizes = [8, 8], strides = [1, 1]} : vector<8x32xf32> to vector<8x8xf32>
    %67 = vector.extract_strided_slice %22 {offsets = [0, 16], sizes = [8, 8], strides = [1, 1]} : vector<8x32xf32> to vector<8x8xf32>
    %cst_35 = arith.constant dense<0.000000e+00> : vector<8x8xf32>
    %68 = tpu.matmul %65, %66, %cst_35 {dimension_numbers = #tpu.dot_dimension_numbers<[1], [1], [0], [0], [0, 0, 1, 0], [], []>} : vector<8x8xf32>, vector<8x8xf32>, vector<8x8xf32> -> vector<8x8xf32>
    %cst_36 = arith.constant 5.000000e-01 : f32
    %69 = vector.broadcast %cst_36 : f32 to vector<1x8xf32>
    %70 = arith.cmpf ogt, %5, %69 : vector<1x8xf32>
    %cst_37 = arith.constant -1.000000e+09 : f32
    %71 = vector.shape_cast %70 : vector<1x8xi1> to vector<1x8xi1>
    %72 = vector.broadcast %71 : vector<1x8xi1> to vector<8x8xi1>
    %73 = vector.broadcast %cst_37 : f32 to vector<8x8xf32>
    %74 = arith.select %72, %73, %68 : vector<8x8xi1>, vector<8x8xf32>
    %cst_38 = arith.constant dense<0xFF800000> : vector<8xf32>
    %75 = vector.multi_reduction <maximumf>, %74, %cst_38 [1] : vector<8x8xf32> to vector<8xf32>
    %76 = vector.shape_cast %75 : vector<8xf32> to vector<8x1xf32>
    %77 = vector.broadcast %76 : vector<8x1xf32> to vector<8x8xf32>
    %78 = arith.subf %74, %77 : vector<8x8xf32>
    %79 = math.exp %78 : vector<8x8xf32>
    %cst_39 = arith.constant dense<0.000000e+00> : vector<8xf32>
    %80 = vector.multi_reduction <add>, %79, %cst_39 [1] : vector<8x8xf32> to vector<8xf32>
    %81 = vector.shape_cast %80 : vector<8xf32> to vector<8x1xf32>
    %82 = tpu.reciprocal %81 {approx = true} : vector<8x1xf32> -> vector<8x1xf32>
    %83 = vector.broadcast %82 : vector<8x1xf32> to vector<8x8xf32>
    %84 = arith.mulf %79, %83 : vector<8x8xf32>
    %cst_40 = arith.constant dense<0.000000e+00> : vector<8x8xf32>
    %85 = tpu.matmul %84, %67, %cst_40 {dimension_numbers = #tpu.dot_dimension_numbers<[1], [0], [0], [1], [0, 0, 1, 1], [], []>} : vector<8x8xf32>, vector<8x8xf32>, vector<8x8xf32> -> vector<8x8xf32>
    %86 = vector.extract_strided_slice %12 {offsets = [0, 24], sizes = [8, 8], strides = [1, 1]} : vector<8x32xf32> to vector<8x8xf32>
    %87 = vector.extract_strided_slice %17 {offsets = [0, 24], sizes = [8, 8], strides = [1, 1]} : vector<8x32xf32> to vector<8x8xf32>
    %88 = vector.extract_strided_slice %22 {offsets = [0, 24], sizes = [8, 8], strides = [1, 1]} : vector<8x32xf32> to vector<8x8xf32>
    %cst_41 = arith.constant dense<0.000000e+00> : vector<8x8xf32>
    %89 = tpu.matmul %86, %87, %cst_41 {dimension_numbers = #tpu.dot_dimension_numbers<[1], [1], [0], [0], [0, 0, 1, 0], [], []>} : vector<8x8xf32>, vector<8x8xf32>, vector<8x8xf32> -> vector<8x8xf32>
    %cst_42 = arith.constant 5.000000e-01 : f32
    %90 = vector.broadcast %cst_42 : f32 to vector<1x8xf32>
    %91 = arith.cmpf ogt, %5, %90 : vector<1x8xf32>
    %cst_43 = arith.constant -1.000000e+09 : f32
    %92 = vector.shape_cast %91 : vector<1x8xi1> to vector<1x8xi1>
    %93 = vector.broadcast %92 : vector<1x8xi1> to vector<8x8xi1>
    %94 = vector.broadcast %cst_43 : f32 to vector<8x8xf32>
    %95 = arith.select %93, %94, %89 : vector<8x8xi1>, vector<8x8xf32>
    %cst_44 = arith.constant dense<0xFF800000> : vector<8xf32>
    %96 = vector.multi_reduction <maximumf>, %95, %cst_44 [1] : vector<8x8xf32> to vector<8xf32>
    %97 = vector.shape_cast %96 : vector<8xf32> to vector<8x1xf32>
    %98 = vector.broadcast %97 : vector<8x1xf32> to vector<8x8xf32>
    %99 = arith.subf %95, %98 : vector<8x8xf32>
    %100 = math.exp %99 : vector<8x8xf32>
    %cst_45 = arith.constant dense<0.000000e+00> : vector<8xf32>
    %101 = vector.multi_reduction <add>, %100, %cst_45 [1] : vector<8x8xf32> to vector<8xf32>
    %102 = vector.shape_cast %101 : vector<8xf32> to vector<8x1xf32>
    %103 = tpu.reciprocal %102 {approx = true} : vector<8x1xf32> -> vector<8x1xf32>
    %104 = vector.broadcast %103 : vector<8x1xf32> to vector<8x8xf32>
    %105 = arith.mulf %100, %104 : vector<8x8xf32>
    %cst_46 = arith.constant dense<0.000000e+00> : vector<8x8xf32>
    %106 = tpu.matmul %105, %88, %cst_46 {dimension_numbers = #tpu.dot_dimension_numbers<[1], [0], [0], [1], [0, 0, 1, 1], [], []>} : vector<8x8xf32>, vector<8x8xf32>, vector<8x8xf32> -> vector<8x8xf32>
    %107 = tpu.concatenate %43, %64, %85, %106 in 1 : vector<8x8xf32>, vector<8x8xf32>, vector<8x8xf32>, vector<8x8xf32> -> vector<8x32xf32>
    %c0_47 = arith.constant 0 : index
    %c0_48 = arith.constant 0 : index
    %108 = vector.load %arg12[%c0_47, %c0_48] : memref<32x32xf32, #tpu.memory_space<vmem>>, vector<32x32xf32>
    %cst_49 = arith.constant dense<0.000000e+00> : vector<8x32xf32>
    %109 = tpu.matmul %107, %108, %cst_49 {dimension_numbers = #tpu.dot_dimension_numbers<[1], [0], [0], [1], [0, 0, 1, 1], [], []>} : vector<8x32xf32>, vector<32x32xf32>, vector<8x32xf32> -> vector<8x32xf32>
    %c0_50 = arith.constant 0 : index
    %c0_51 = arith.constant 0 : index
    %110 = vector.load %arg13[%c0_50, %c0_51] : memref<1x32xf32, #tpu.memory_space<vmem>>, vector<1x32xf32>
    %111 = vector.broadcast %110 : vector<1x32xf32> to vector<8x32xf32>
    %112 = arith.addf %109, %111 : vector<8x32xf32>
    %113 = arith.addf %112, %1 : vector<8x32xf32>
    %cst_52 = arith.constant dense<0.000000e+00> : vector<8xf32>
    %114 = vector.multi_reduction <add>, %113, %cst_52 [1] : vector<8x32xf32> to vector<8xf32>
    %115 = vector.shape_cast %114 : vector<8xf32> to vector<8x1xf32>
    %cst_53 = arith.constant 3.200000e+01 : f32
    %116 = vector.broadcast %cst_53 : f32 to vector<8x1xf32>
    %117 = arith.divf %115, %116 : vector<8x1xf32>
    %118 = vector.broadcast %117 : vector<8x1xf32> to vector<8x32xf32>
    %119 = arith.subf %113, %118 : vector<8x32xf32>
    %120 = arith.mulf %119, %119 : vector<8x32xf32>
    %cst_54 = arith.constant dense<0.000000e+00> : vector<8xf32>
    %121 = vector.multi_reduction <add>, %120, %cst_54 [1] : vector<8x32xf32> to vector<8xf32>
    %122 = vector.shape_cast %121 : vector<8xf32> to vector<8x1xf32>
    %cst_55 = arith.constant 3.200000e+01 : f32
    %123 = vector.broadcast %cst_55 : f32 to vector<8x1xf32>
    %124 = arith.divf %122, %123 : vector<8x1xf32>
    %cst_56 = arith.constant 9.99999997E-7 : f32
    %125 = vector.broadcast %cst_56 : f32 to vector<8x1xf32>
    %126 = arith.addf %124, %125 : vector<8x1xf32>
    %127 = math.rsqrt %126 : vector<8x1xf32>
    %128 = vector.broadcast %127 : vector<8x1xf32> to vector<8x32xf32>
    %129 = arith.mulf %119, %128 : vector<8x32xf32>
    %c0_57 = arith.constant 0 : index
    %c0_58 = arith.constant 0 : index
    %130 = vector.load %arg14[%c0_57, %c0_58] : memref<1x32xf32, #tpu.memory_space<vmem>>, vector<1x32xf32>
    %131 = vector.broadcast %130 : vector<1x32xf32> to vector<8x32xf32>
    %132 = arith.mulf %129, %131 : vector<8x32xf32>
    %c0_59 = arith.constant 0 : index
    %c0_60 = arith.constant 0 : index
    %133 = vector.load %arg15[%c0_59, %c0_60] : memref<1x32xf32, #tpu.memory_space<vmem>>, vector<1x32xf32>
    %134 = vector.broadcast %133 : vector<1x32xf32> to vector<8x32xf32>
    %135 = arith.addf %132, %134 : vector<8x32xf32>
    %c0_61 = arith.constant 0 : index
    %c0_62 = arith.constant 0 : index
    %c0_63 = arith.constant 0 : index
    %136 = vector.load %arg5[%c0_61, %c0_62, %c0_63] : memref<1x8x1xf32, #tpu.memory_space<vmem>>, vector<1x8x1xf32>
    %137 = vector.shape_cast %136 : vector<1x8x1xf32> to vector<8x1xf32>
    %138 = vector.broadcast %137 : vector<8x1xf32> to vector<8x32xf32>
    %139 = arith.mulf %135, %138 : vector<8x32xf32>
    %c0_64 = arith.constant 0 : index
    %c0_65 = arith.constant 0 : index
    %c0_66 = arith.constant 0 : index
    %140 = vector.load %arg16[%c0_64, %c0_65, %c0_66] : memref<1x8x32xf32, #tpu.memory_space<vmem>>, vector<1x8x32xf32>
    %141 = vector.shape_cast %140 : vector<1x8x32xf32> to vector<8x32xf32>
    %142 = vector.shape_cast %139 : vector<8x32xf32> to vector<1x8x32xf32>
    tpu.vector_store %arg16[%c0_64, %c0_65, %c0_66], %142 {strides = array<i32>} : memref<1x8x32xf32, #tpu.memory_space<vmem>>, vector<1x8x32xf32>,
    return
  }
  func.func @transform_0(%arg0: i32, %arg1: i32) -> (i32, i32, i32) {
    %c0_i32 = arith.constant 0 : i32
    %c0_i32_0 = arith.constant 0 : i32
    return %arg0, %arg1, %c0_i32 : i32, i32, i32
  }
  func.func @transform_1(%arg0: i32, %arg1: i32) -> (i32, i32, i32) {
    %c0_i32 = arith.constant 0 : i32
    %c0_i32_0 = arith.constant 0 : i32
    %c0_i32_1 = arith.constant 0 : i32
    return %arg0, %c0_i32, %c0_i32_0 : i32, i32, i32
  }
  func.func @transform_2(%arg0: i32, %arg1: i32) -> (i32, i32, i32) {
    %c0_i32 = arith.constant 0 : i32
    %c0_i32_0 = arith.constant 0 : i32
    %c0_i32_1 = arith.constant 0 : i32
    return %arg0, %c0_i32, %c0_i32_0 : i32, i32, i32
  }
  func.func @transform_3(%arg0: i32, %arg1: i32) -> (i32, i32, i32) {
    %c0_i32 = arith.constant 0 : i32
    %c0_i32_0 = arith.constant 0 : i32
    return %arg0, %arg1, %c0_i32 : i32, i32, i32
  }
  func.func @transform_4(%arg0: i32, %arg1: i32) -> (i32, i32) {
    %c0_i32 = arith.constant 0 : i32
    %c0_i32_0 = arith.constant 0 : i32
    %c0_i32_1 = arith.constant 0 : i32
    return %c0_i32, %c0_i32_0 : i32, i32
  }
  func.func @transform_5(%arg0: i32, %arg1: i32) -> (i32, i32) {
    %c0_i32 = arith.constant 0 : i32
    %c0_i32_0 = arith.constant 0 : i32
    %c0_i32_1 = arith.constant 0 : i32
    return %c0_i32, %c0_i32_0 : i32, i32
  }
  func.func @transform_6(%arg0: i32, %arg1: i32) -> (i32, i32) {
    %c0_i32 = arith.constant 0 : i32
    %c0_i32_0 = arith.constant 0 : i32
    %c0_i32_1 = arith.constant 0 : i32
    return %c0_i32, %c0_i32_0 : i32, i32
  }
  func.func @transform_7(%arg0: i32, %arg1: i32) -> (i32, i32) {
    %c0_i32 = arith.constant 0 : i32
    %c0_i32_0 = arith.constant 0 : i32
    %c0_i32_1 = arith.constant 0 : i32
    return %c0_i32, %c0_i32_0 : i32, i32
  }
  func.func @transform_8(%arg0: i32, %arg1: i32) -> (i32, i32) {
    %c0_i32 = arith.constant 0 : i32
    %c0_i32_0 = arith.constant 0 : i32
    %c0_i32_1 = arith.constant 0 : i32
    return %c0_i32, %c0_i32_0 : i32, i32
  }
  func.func @transform_9(%arg0: i32, %arg1: i32) -> (i32, i32) {
    %c0_i32 = arith.constant 0 : i32
    %c0_i32_0 = arith.constant 0 : i32
    %c0_i32_1 = arith.constant 0 : i32
    return %c0_i32, %c0_i32_0 : i32, i32
  }
  func.func @transform_10(%arg0: i32, %arg1: i32) -> (i32, i32) {
    %c0_i32 = arith.constant 0 : i32
    %c0_i32_0 = arith.constant 0 : i32
    %c0_i32_1 = arith.constant 0 : i32
    return %c0_i32, %c0_i32_0 : i32, i32
  }
  func.func @transform_11(%arg0: i32, %arg1: i32) -> (i32, i32) {
    %c0_i32 = arith.constant 0 : i32
    %c0_i32_0 = arith.constant 0 : i32
    %c0_i32_1 = arith.constant 0 : i32
    return %c0_i32, %c0_i32_0 : i32, i32
  }
  func.func @transform_12(%arg0: i32, %arg1: i32) -> (i32, i32) {
    %c0_i32 = arith.constant 0 : i32
    %c0_i32_0 = arith.constant 0 : i32
    %c0_i32_1 = arith.constant 0 : i32
    return %c0_i32, %c0_i32_0 : i32, i32
  }
  func.func @transform_13(%arg0: i32, %arg1: i32) -> (i32, i32) {
    %c0_i32 = arith.constant 0 : i32
    %c0_i32_0 = arith.constant 0 : i32
    %c0_i32_1 = arith.constant 0 : i32
    return %c0_i32, %c0_i32_0 : i32, i32
  }
  func.func @transform_14(%arg0: i32, %arg1: i32) -> (i32, i32, i32) {
    %c0_i32 = arith.constant 0 : i32
    %c0_i32_0 = arith.constant 0 : i32
    return %arg0, %arg1, %c0_i32 : i32, i32, i32
  }
}

</mosaic_0001>

<bundles_post_ra>
// kernel: tpu_custom_call.1
= control target key start
LH: loop header
LB: loop body
LE: loop exit
PB: predicated region body
PF: predicated region fallthrough
CT: control target
= control target key end

     0   :  { %s3053_s0 = inlined_call_operand.hbm [shape: f32[2,8,32], index: 0, kind: input, shape index: {}]   ;;  %s3054_s1 = inlined_call_operand.hbm [shape: f32[2,8,32], index: 1, kind: input, shape index: {}]   ;;  %s3055_s2 = inlined_call_operand.hbm [shape: f32[2,1,8], index: 2, kind: input, shape index: {}]   ;;  %s3056_s3 = inlined_call_operand.vmem [shape: f32[2,8,1], index: 3, kind: input, shape index: {}]   ;;  %s3057_s4 = inlined_call_operand.hbm [shape: f32[32,32], index: 4, kind: input, shape index: {}]   ;;  %s3058_s5 = inlined_call_operand.hbm [shape: f32[1,32], index: 5, kind: input, shape index: {}]   ;;  %s3059_s6 = inlined_call_operand.hbm [shape: f32[32,32], index: 6, kind: input, shape index: {}]   ;;  %s3060_s7 = inlined_call_operand.hbm [shape: f32[1,32], index: 7, kind: input, shape index: {}]   ;;  %s3061_s8 = inlined_call_operand.vmem [shape: f32[32,32], index: 8, kind: input, shape index: {}]   ;;  %s3062_s9 = inlined_call_operand.vmem [shape: f32[1,32], index: 9, kind: input, shape index: {}]   ;;  %s3063_s10 = inlined_call_operand.hbm [shape: f32[32,32], index: 10, kind: input, shape index: {}]   ;;  %s3064_s11 = inlined_call_operand.vmem [shape: f32[1,32], index: 11, kind: input, shape index: {}]   ;;  %s3065_s12 = inlined_call_operand.vmem [shape: f32[1,32], index: 12, kind: input, shape index: {}]   ;;  %s3066_s13 = inlined_call_operand.vmem [shape: f32[1,32], index: 13, kind: input, shape index: {}]   ;;  %s3067_s14 = inlined_call_operand.hbm [shape: f32[2,8,32], index: 14, kind: output, shape index: {}]  }
   0x1   :  { %3085 = sst [smem:[#allocation30_spill]] %s3056_s3 }
   0x2   :  { %3086 = sst [smem:[#allocation31_spill]] %s3057_s4 }
   0x3   :  { %3087 = sst [smem:[#allocation32_spill]] %s3059_s6 }
   0x4   :  { %3088 = sst [smem:[#allocation33_spill]] %s3064_s11 }
   0x5   :  { %3089 = sst [smem:[#allocation34_spill]] %s3065_s12 }
   0x6   :  { %3090 = sst [smem:[#allocation35_spill]] %s3066_s13 }
   0x7   :  { %3091 = sst [smem:[#allocation36_spill]] %s3067_s14 }
   0x8   :  { %19 = vsyncpa [#allocation3], 0 }
   0x9   :  { %21 = vsyncpa [#allocation3 + $0x1], 0 }
   0xa   :  { %22 = vsyncpa [#allocation6], 0 }
   0xb   :  { %24 = vsyncpa [#allocation6 + $0x1], 0 }
   0xc   :  { %25 = vsyncpa [#allocation9], 0 }
   0xd   :  { %26 = vsyncpa [#allocation12], 0 }
   0xe   :  { %27 = vsyncpa [#allocation15], 0 }
   0xf   :  { %28 = vsyncpa [#allocation4], 0 }
  0x10   :  { %30 = vsyncpa [#allocation4 + $0x1], 0  ;;  %s2655_s29 = smov 0   ;;  %s2657_s30 = smov 0  }
  0x11   :  { %s2659_s15 = smov 0   ;;  %s2661_s16 = smov 0  }
  0x12   :  { %s2663_s17 = smov 0   ;;  %s2665_s18 = smov 0  }
  0x13 LB: > { %3092 = sst [smem:[#allocation23_spill]] %s2538_s29  ;;  %s2686_s19 = sadd.s32 4294967295, %s2558_s18   ;;  %s2558_s18 = sphi %s2665_s18, %s36_s18   ;;  %s2554_s17 = sphi %s2663_s17, %s3140_s17   ;;  %s2550_s16 = sphi %s2661_s16, %s3139_s16   ;;  %s2546_s15 = sphi %s2659_s15, %s3135_s15   ;;  %s2542_s30 = sphi %s2657_s30, %s3138_s30   ;;  %s2538_s29 = sphi %s2655_s29, %s3137_s29  }
  0x14   : > { %3093 = sst [smem:[#allocation24_spill]] %s2546_s15  ;;  %p1927_p0 = scmp.ge.s32.totalorder %s2558_s18, 1 }
  0x15   : > { %3094 = sst [smem:[#allocation25_spill]] %s2558_s18  ;;  %p3071_p1 = scmp.eq.s32.totalorder %s2686_s19, 0 }
  0x16   : > { %p399_p2 = scmp.lt.s32.totalorder %s2558_s18, 3  ;;  %s2560_s21 = smov [#allocation8]  }
  0x17   : > { %s411_s22 = sshll.u32 %s2560_s21, 4  ;;  %s2561_s24 = smov [#allocation11]   ;;  %s412_s22 = int_to_ptr.vmem [resolvable:$true] %s411_s22 }
  0x18   : > { %p2691_p3 = pnand %p1927_p0, %p399_p2  ;;  %s435_s25 = sshll.u32 %s2561_s24, 4  ;;  %s436_s25 = int_to_ptr.vmem [resolvable:$true] %s435_s25 }
  0x19   : > { %s2259_s27 = scalar_lea.vmem %s412_s22, 512  ;;  %p2267_p11 = scmp.lt.s32.totalorder %s412_s22, %s412_s22 }
  0x1a   : > { %s3095_s20 = scalar_select %p2691_p3, 1, 0 }
  0x1b   : > { %p2123_p4 = pneg %p2691_p3  ;;  %p2260_p8 = scmp.ne.s32.totalorder %s412_s22, %s2259_s27 }
  0x1c   : > { %p2268_p12 = scmp.lt.s32.totalorder %s2259_s27, %s2259_s27 }
  0x1d   : > { %p2700_p6 = pnand %p2123_p4, %p3071_p1 }
  0x1e   : > { %p2269_p13 = por %p2268_p12, %p2267_p11 }
  0x1f   : > { %p2706_p7 = pneg %p2700_p6 }
  0x21   : > { %p2262_p9 = pnand %p2260_p8, %p2706_p7 }
  0x23   : > { %p2263_p10 = pneg %p2262_p9 }
  0x25   : > { %p2270_p0 = pnand %p2269_p13, %p2263_p10 }
  0x27   : > { %2273 = shalt.err (!%p2270_p0)
}
  0x28   : > { %s3069_s28 = smov 128   ;;  %s3070_s21 = smov 8  }
  0x29   : > { %s3098_s4 = sld [smem:[#allocation31_spill]]  ;;  %s2285_s13 = scalar_lea.vmem %s436_s25, 512 }
  0x2a   : > { %p2286_p2 = scmp.ne.s32.totalorder %s436_s25, %s2285_s13  ;;  %p2293_p9 = scmp.lt.s32.totalorder %s436_s25, %s436_s25 }
  0x2b   : > { %p2294_p10 = scmp.lt.s32.totalorder %s2285_s13, %s2285_s13 }
  0x2c   : > { %p2288_p4 = pnand %p2286_p2, %p2706_p7 }
  0x2d   : > { %p2295_p11 = por %p2294_p10, %p2293_p9 }
  0x2e   : > { %p2289_p8 = pneg %p2288_p4 }
  0x2f   : > { %2126 = dma.hbm_to_vmem [thread:$0]  (!%p2700_p6), %s3098_s4, 512, %s412_s22, [#allocation9], %s3069_s28, %s3069_s28, %s3070_s21  }
  0x30   : > { %p2296_p12 = pnand %p2295_p11, %p2289_p8 }
  0x32   : > { %2299 = shalt.err (!%p2296_p12)
}
  0x33   : > { %s3099_s6 = sld [smem:[#allocation32_spill]]  ;;  %s1926_s13 = sadd.s32 4294967294, %s2558_s18  }
  0x34   : > { %s48_s14 = sadd.s32 1, %s2554_s17  ;;  %s57_s22 = sadd.s32 1, %s2546_s15 }
  0x35   : > { %p50_p13 = scmp.ge.s32.totalorder %s48_s14, 2  ;;  %p64_p0 = scmp.ne.s32.totalorder %s2546_s15, %s2542_s30 }
  0x36   : > { %p65_p2 = scmp.eq.s32.totalorder %s2558_s18, 0  ;;  %p70_p8 = scmp.ne.s32.totalorder %s2542_s30, %s2538_s29 }
  0x37   : > { %s3142_s14 = smov (%p50_p13, %s48_s14), 0  ;;  %p386_p9 = scmp.eq.s32.totalorder %s2686_s19, 1 }
  0x38   : > { %3100 = sst [smem:[#allocation26_spill]] %s3142_s14  ;;  %p2738_p4 = por %p65_p2, %p64_p0 }
  0x39   : > { %2132 = dma.hbm_to_vmem [thread:$0]  (!%p2700_p6), %s3099_s6, 512, %s436_s25, [#allocation12], %s3069_s28, %s3069_s28, %s3070_s21  }
  0x3a   : > { %s52_s25 = ssub.s32 %s2554_s17, %s3142_s14  ;;  %p2749_p11 = por %p3071_p1, %p70_p8 }
  0x3b   : > { %p55_p10 = scmp.eq.s32.totalorder %s52_s25, 0  ;;  %p2753_p12 = por %p386_p9, %p64_p0 }
  0x3c   : > { %s3102_s24 = scalar_select %p2749_p11, 1, 0 }
  0x3d   : > { %s3103_s27 = scalar_select %p2753_p12, 1, 0 }
  0x3e   : > { %p392_p13 = scmp.eq.s32.totalorder %s1926_s13, 1  ;;  %p2158_p5 = scmp.lt.s32.totalorder %s2558_s18, 2 }
  0x3f   : > { %3104 = sst [smem:[#allocation27_spill]] %s3103_s27  ;;  %s2766_s4 = sand.u32 1, %s2546_s15  }
  0x40   : > { %s2758_s28 = scalar_select %p55_p10, %s2546_s15, %s57_s22  }
  0x41   : > { %p2760_p2 = por %p392_p13, %p70_p8  ;;  %s1935_s25 = sshll.u32 %s2554_s17, 7 }
  0x42   : > { %3105 = sst [smem:[#allocation28_spill]] %s2758_s28  ;;  %s3080_s6 = sshll.u32 %s2766_s4, 3 }
  0x43   : > { %s3106_s21 = scalar_select %p2760_p2, 1, 0 }
  0x44   : > { %p2772_p1 = pnand %p2158_p5, %p2738_p4  ;;  %s507_s13 = sand.u32 1, %s2558_s18  }
  0x45   : > { %3107 = sst [smem:[#allocation29_spill]] %s3106_s21  ;;  %s516_s21 = scalar_lea.hbm %s3054_s1, %s1935_s25 }
  0x46   : > { %s511_s15 = scalar_lea.vmem [#allocation5], %s3080_s6  ;;  %s2784_s27 = scalar_lea.sflag [#allocation6], %s507_s13 }
  0x47   : > { %s518_s29 = sshll.u32 %s511_s15, 4  ;;  %p3081_p0 = pneg %p2772_p1  ;;  %s519_s29 = int_to_ptr.vmem [resolvable:$true] %s518_s29 }
  0x48   : > { %s2313_s12 = scalar_lea.vmem %s519_s29, 128  ;;  %s2564_s18 = smov [#allocation5]  }
  0x49   : > { %p2314_p5 = scmp.ne.s32.totalorder %s519_s29, %s2313_s12  ;;  %s2318_s3 = sshll.u32 %s2564_s18, 4  ;;  %s2319_s3 = int_to_ptr.vmem [resolvable:$false] %s2318_s3 }
  0x4a   : > { %s2320_s11 = scalar_lea.vmem %s2319_s3, 256  ;;  %p2321_p9 = scmp.lt.s32.totalorder %s519_s29, %s2319_s3 }
  0x4b   : > { %p2316_p4 = pnand %p2314_p5, %p3081_p0  ;;  %p2322_p10 = scmp.lt.s32.totalorder %s2320_s11, %s2313_s12 }
  0x4d   : > { %p2317_p8 = pneg %p2316_p4  ;;  %p2323_p13 = por %p2322_p10, %p2321_p9 }
  0x4f   : > { %p2324_p2 = pnand %p2323_p13, %p2317_p8 }
  0x51   : > { %2327 = shalt.err (!%p2324_p2)
}
  0x52   : > { %2145 = dma.hbm_to_vmem [thread:$0]  (!%p2772_p1), %s516_s21, 128, %s519_s29, %s2784_s27  }
  0x53   : > { %s2565_s15 = smov [#allocation10]   ;;  %s2566_s13 = smov [#allocation13]  }
  0x54   : > { %s425_s28 = sshll.u32 %s2565_s15, 4  ;;  %s449_s22 = sshll.u32 %s2566_s13, 4  ;;  %s426_s28 = int_to_ptr.vmem [resolvable:$true] %s425_s28  ;;  %s450_s22 = int_to_ptr.vmem [resolvable:$true] %s449_s22 }
  0x55   : > { %s2339_s6 = scalar_lea.vmem %s426_s28, 16  ;;  %s2346_s3 = scalar_lea.vmem %s426_s28, 32 }
  0x56   : > { %p2340_p5 = scmp.ne.s32.totalorder %s426_s28, %s2339_s6  ;;  %p2347_p12 = scmp.lt.s32.totalorder %s426_s28, %s426_s28 }
  0x57   : > { %p2348_p9 = scmp.lt.s32.totalorder %s2346_s3, %s2339_s6 }
  0x58   : > { %p2342_p4 = pnand %p2340_p5, %p2706_p7 }
  0x59   : > { %p2349_p8 = por %p2348_p9, %p2347_p12 }
  0x5a   : > { %p2343_p0 = pneg %p2342_p4 }
  0x5c   : > { %p2350_p2 = pnand %p2349_p8, %p2343_p0 }
  0x5e   : > { %2353 = shalt.err (!%p2350_p2)
}
  0x5f   : > { %2129 = dma.hbm_to_vmem [thread:$0]  (!%p2700_p6), %s3058_s5, 16, %s426_s28, [#allocation9]  }
  0x60   : > { %s2365_s18 = scalar_lea.vmem %s450_s22, 16  ;;  %s2372_s21 = scalar_lea.vmem %s450_s22, 32 }
  0x61   : > { %p2366_p10 = scmp.ne.s32.totalorder %s450_s22, %s2365_s18  ;;  %p2373_p4 = scmp.lt.s32.totalorder %s450_s22, %s450_s22 }
  0x62   : > { %p2374_p11 = scmp.lt.s32.totalorder %s2372_s21, %s2365_s18 }
  0x63   : > { %p2368_p13 = pnand %p2366_p10, %p2706_p7 }
  0x64   : > { %p2375_p3 = por %p2374_p11, %p2373_p4 }
  0x65   : > { %p2369_p5 = pneg %p2368_p13 }
  0x67   : > { %p2376_p12 = pnand %p2375_p3, %p2369_p5 }
  0x69   : > { %2379 = shalt.err (!%p2376_p12)
}
  0x6a   : > { %2135 = dma.hbm_to_vmem [thread:$0]  (!%p2700_p6), %s3060_s7, 16, %s450_s22, [#allocation12]  }
  0x6b   : > { %s2567_s15 = smov [#allocation14]  }
  0x6c   : > { %s465_s28 = sshll.u32 %s2567_s15, 4  ;;  %s466_s28 = int_to_ptr.vmem [resolvable:$true] %s465_s28 }
  0x6d   : > { %s2391_s13 = scalar_lea.vmem %s466_s28, 512  ;;  %p2399_p2 = scmp.lt.s32.totalorder %s466_s28, %s466_s28 }
  0x6e   : > { %p2392_p0 = scmp.ne.s32.totalorder %s466_s28, %s2391_s13  ;;  %p2400_p10 = scmp.lt.s32.totalorder %s2391_s13, %s2391_s13 }
  0x70   : > { %p2394_p9 = pnand %p2392_p0, %p2706_p7  ;;  %p2401_p11 = por %p2400_p10, %p2399_p2 }
  0x72   : > { %p2395_p8 = pneg %p2394_p9 }
  0x74   : > { %p2402_p3 = pnand %p2401_p11, %p2395_p8 }
  0x76   : > { %2405 = shalt.err (!%p2402_p3)
}
  0x77   : > { %s3109_s3 = smov 8   ;;  %s3110_s11 = smov 128  }
  0x78   : > { %2138 = dma.hbm_to_vmem [thread:$0]  (!%p2700_p6), %s3063_s10, 512, %s466_s28, [#allocation15], %s3110_s11, %s3110_s11, %s3109_s3  }
  0x79   : > { %s498_s21 = scalar_lea.hbm %s3053_s0, %s1935_s25  ;;  %s3111_s6 = sshll.u32 %s2766_s4, 3 }
  0x7a   : > { %s492_s12 = scalar_lea.vmem [#allocation2], %s3111_s6  ;;  %s489_s23 = scalar_lea.sflag [#allocation3], %s2766_s4 }
  0x7b   : > { %s500_s15 = sshll.u32 %s492_s12, 4  ;;  %p3112_p13 = pneg %p2772_p1  ;;  %s501_s15 = int_to_ptr.vmem [resolvable:$true] %s500_s15 }
  0x7c   : > { %s2419_s13 = scalar_lea.vmem %s501_s15, 128  ;;  %s2568_s29 = smov [#allocation2]  }
  0x7d   : > { %p2420_p7 = scmp.ne.s32.totalorder %s501_s15, %s2419_s13  ;;  %s2424_s22 = sshll.u32 %s2568_s29, 4  ;;  %s2425_s22 = int_to_ptr.vmem [resolvable:$false] %s2424_s22 }
  0x7e   : > { %s2426_s28 = scalar_lea.vmem %s2425_s22, 256  ;;  %p2427_p6 = scmp.lt.s32.totalorder %s501_s15, %s2425_s22 }
  0x7f   : > { %p2422_p5 = pnand %p2420_p7, %p3112_p13  ;;  %p2428_p12 = scmp.lt.s32.totalorder %s2426_s28, %s2419_s13 }
  0x81   : > { %p2423_p4 = pneg %p2422_p5  ;;  %p2429_p0 = por %p2428_p12, %p2427_p6 }
  0x83   : > { %p2430_p9 = pnand %p2429_p0, %p2423_p4 }
  0x85   : > { %2433 = shalt.err (!%p2430_p9)
}
  0x86   : > { %2142 = dma.hbm_to_vmem [thread:$0]  (!%p2772_p1), %s498_s21, 128, %s501_s15, %s489_s23  }
  0x87   : > { %s1938_s25 = sshll.u32 %s2554_s17, 4  ;;  %s528_s3 = scalar_lea.vmem [#allocation7], %s2766_s4 }
  0x88   : > { %s535_s11 = sshll.u32 %s528_s3, 4  ;;  %s533_s6 = scalar_lea.hbm %s3055_s2, %s1938_s25  ;;  %s536_s11 = int_to_ptr.vmem [resolvable:$true] %s535_s11 }
  0x89   : > { %s2447_s12 = scalar_lea.vmem %s536_s11, 16  ;;  %p3113_p2 = pmov %p3112_p13 }
  0x8a   : > { %p2448_p8 = scmp.ne.s32.totalorder %s536_s11, %s2447_s12  ;;  %s2569_s13 = smov [#allocation7]  }
  0x8b   : > { %s2452_s29 = sshll.u32 %s2569_s13, 4  ;;  %s2453_s29 = int_to_ptr.vmem [resolvable:$false] %s2452_s29 }
  0x8c   : > { %p2450_p10 = pnand %p2448_p8, %p3113_p2  ;;  %s2454_s22 = scalar_lea.vmem %s2453_s29, 32 }
  0x8d   : > { %p2455_p3 = scmp.lt.s32.totalorder %s536_s11, %s2453_s29  ;;  %p2456_p7 = scmp.lt.s32.totalorder %s2454_s22, %s2447_s12 }
  0x8e   : > { %p2451_p11 = pneg %p2450_p10 }
  0x8f   : > { %p2457_p13 = por %p2456_p7, %p2455_p3 }
  0x91   : > { %p2458_p5 = pnand %p2457_p13, %p2451_p11 }
  0x93   : > { %2461 = shalt.err (!%p2458_p5)
}
  0x94   : > { %2148 = dma.hbm_to_vmem [thread:$0]  (!%p2772_p1), %s533_s6, 16, %s536_s11, %s2784_s27  }
  0x95   : > { %p3114_p4 = scmp.ne.s32.totalorder %s3095_s20, 0 }
  0x96   : > { %s2845_s4 = sand.u32 (!%p3114_p4), 1, %s2542_s30   ;;  %p3115_p6 = scmp.ne.s32.totalorder (!%p3114_p4), %s3102_s24, 0 }
  0x97   : > { %554 = sbr.rel (%p3114_p4) target bundleno = 2287 (0x8ef), region = 76  ;;  %s2848_s21 = sshll.u32 (!%p3114_p4), %s2845_s4, 3 }
  0x98   : > { %s557_s15 = scalar_lea.sflag (!%p3114_p4), [#allocation3], %s2845_s4  ;;  %s560_s23 = scalar_lea.vmem (!%p3114_p4), [#allocation2], %s2848_s21 }
  0x9c   : > { %2513 = dma.done.wait (%p3115_p6), %s557_s15, 128  }
  0x9d   : > { %2515 = vsyncadd (%p3115_p6), %s557_s15, 4294967168  ;;  %s565_s20 = sand.u32 1, %s2686_s19   ;;  %s569_s27 = scalar_lea.vmem [#allocation5], %s2848_s21 }
  0x9e   : > { %s566_s14 = scalar_lea.sflag [#allocation6], %s565_s20 }
  0x9f   : > { %2517 = dma.done.wait (%p3115_p6), %s566_s14, 144  }
  0xa0   : > { %2519 = vsyncadd (%p3115_p6), %s566_s14, 4294967152  ;;  %s577_s28 = scalar_lea.vmem [#allocation7], %s2845_s4  ;;  %p3116_p1 = scmp.eq.s32.totalorder %s2686_s19, 0 }
  0xa2   : > { %2521 = dma.done.wait (%p3116_p1), [#allocation9], 528   ;;  %p3117_p12 = pmov %p3116_p1 }
  0xa3   : > { %p3118_p0 = pmov %p3116_p1 }
  0xa4   : > { %2523 = vsyncadd (%p3117_p12), [#allocation9], 4294966768 }
  0xa5   : > { %2525 = dma.done.wait (%p3118_p0), [#allocation12], 528   ;;  %p3119_p9 = pmov %p3118_p0 }
  0xa6   : > { %p3120_p8 = pmov %p3118_p0 }
  0xa7   : > { %2527 = vsyncadd (%p3119_p9), [#allocation12], 4294966768 }
  0xa8   : > { %2529 = dma.done.wait (%p3120_p8), [#allocation15], 512   ;;  %p3121_p2 = pmov %p3118_p0 }
  0xa9   : > { %v2570_v0 = vmov 0.0   ;;  %vm2571_vm0 = vmmov 0   ;;  %v671_v1 = vld [vmem:[#allocation8 + $0x18] sm:$0xff]  ;;  %v670_v3 = vld [vmem:[#allocation8 + $0x10] sm:$0xff]  ;;  %v669_v5 = vld [vmem:[#allocation8 + $0x8] sm:$0xff]  ;;  %vm679_vm1 = vcmask 261120   ;;  %v998_v25 = vlaneseq }
  0xaa   : > { %2531 = vsyncadd (%p3121_p2), [#allocation15], 4294966784  ;;  %2011 = vmatprep.subr.mxu0 %v2570_v0  ;;  %2022 = vmatprep.subr.mxu1 %v2570_v0  ;;  %v757_v2 = vld [vmem:[#allocation11 + $0x18] sm:$0xff]  ;;  %v756_v4 = vld [vmem:[#allocation11 + $0x10] sm:$0xff]  ;;  %vm919_vm2 = vcmask 64512   ;;  %s2572_s19 = smov 120  }
  0xab   : > { %2019 = vmatprep.mubr.msk.f32.mxu0 %vm2571_vm0, %v2570_v0  ;;  %2030 = vmatprep.mubr.msk.f32.mxu1 %vm2571_vm0, %v2570_v0  ;;  %v755_v6 = vld [vmem:[#allocation11 + $0x8] sm:$0xff]  ;;  %v668_v7 = vld [vmem:[#allocation8] sm:$0xff]  ;;  %s2573_s24 = smov 112   ;;  %s2574_s25 = smov 104   ;;  %v2575_v20 = vmov 0   ;;  %v841_v21 = vld [vmem:[%s3061_s8 + $0x18] sm:$0xff] }
  0xac   : > { %2012 = vmatpush3.msra.mxu0 %v671_v1  ;;  %2023 = vmatpush3.msra.mxu1 %v757_v2  ;;  %v754_v8 = vld [vmem:[#allocation11] sm:$0xff]  ;;  %v666_v10 = vld [vmem:[%s569_s27] sm:$0xff]  ;;  %v1949_v11 = vld [vmem:[#allocation10] ss:$0 sm:$0xff]  ;;  %v999_v27 = vshrl.u32 %v998_v25, 7  ;;  %s2577_s20 = smov 16  }
  0xad   : > { %2013 = vmatprep.subr.mxu0 %v2570_v0  ;;  %2024 = vmatprep.subr.mxu1 %v2570_v0  ;;  %v2887_v9 = vld [vmem:[%s560_s23] sm:$0xff]  ;;  %v840_v22 = vld [vmem:[%s3061_s8 + $0x10] sm:$0xff]  ;;  %s2576_s23 = smov 8   ;;  %s2578_s14 = smov 24   ;;  %vm1600_vm5 = vcmask 130048   ;;  %vm1602_vm6 = vcmask 195584  }
  0xae   : > { %2014 = vmatpush3.msra.mxu0 %v670_v3  ;;  %2025 = vmatpush3.msra.mxu1 %v756_v4  ;;  %v1951_v12 = vld [vmem:[#allocation13] ss:$0 sm:$0xff]  ;;  %v839_v23 = vld [vmem:[%s3061_s8 + $0x8] sm:$0xff]  ;;  %v667_v26 = vld [vmem:[%s577_s28] sm:$0x1]  ;;  %v1000_v28 = vsub.s32 0, %v999_v27 }
  0xaf   : > { %2015 = vmatprep.subr.mxu0 %v2570_v0  ;;  %2026 = vmatprep.subr.mxu1 %v2570_v0  ;;  %v838_v24 = vld [vmem:[%s3061_s8] sm:$0xff]  ;;  %vm996_vm3 = vcmp.gt.f32.partialorder %v667_v26, 0.5  ;;  %p658_p10 = scmp.lt.s32.totalorder %s2550_s16, 1  ;;  %s3123_s26 = sld [smem:[#allocation30_spill]] }
  0xb0   : > { %2016 = vmatpush3.msra.mxu0 %v669_v5  ;;  %2027 = vmatpush3.msra.mxu1 %v755_v6  ;;  %v997_v29 = vsel %vm996_vm3, 1, %v2575_v20  ;;  %v1953_v40 = vld [vmem:[%s3062_s9] ss:$0 sm:$0xff]  ;;  %s3124_s13 = sld [smem:[#allocation34_spill]]  ;;  %s1728_s3 = scalar_lea.sflag [#allocation4], %s2845_s4 }
  0xb1   : > { %2017 = vmatprep.subr.mxu0 %v2570_v0  ;;  %2028 = vmatprep.subr.mxu1 %v2570_v0  ;;  %v1001_v30 = vrot.slane %v997_v29, %v1000_v28  ;;  %s3125_s29 = sld [smem:[#allocation27_spill]] }
  0xb2   : > { %2018 = vmatpush3.msra.mxu0 %v668_v7  ;;  %2029 = vmatpush3.msra.mxu1 %v754_v8 }
  0xb3   : > { %2020 = vmatmul.mubr.msk.f32.vlgmr.msra.gmra.mxu0 %vm679_vm1, %v2887_v9  ;;  %2031 = vmatmul.mubr.msk.f32.vlgmr.msra.gmra.mxu1 %vm679_vm1, %v666_v10  ;;  %vm1002_vm4 = vcmp.eq.s32.totalorder %v1001_v30, 1 }
  0xb4   : > { %2044 = vmatprep.subr.mxu1 %v2570_v0  ;;  %2046 = vmatprep.mubr.msk.f32.mxu1 %vm2571_vm0, %v2570_v0 }
  0xb5   : > { %2033 = vmatprep.subr.mxu0 %v2570_v0  ;;  %2041 = vmatprep.mubr.msk.f32.mxu0 %vm2571_vm0, %v2570_v0 }
  0xb6   : > { %2229 = vset.pattern.permute.xlu0 %v2575_v20  ;;  %2034 = vmatpush3.msra.mxu0 %v841_v21 }
  0xb7   : > { %2035 = vmatprep.subr.mxu0 %v2570_v0  ;;  %p3128_p3 = scmp.ne.s32.totalorder %s3125_s29, 0 }
  0xb8   : > { %2036 = vmatpush3.msra.mxu0 %v840_v22 }
  0xb9   : > { %2037 = vmatprep.subr.mxu0 %v2570_v0 }
  0xba   : > { %2038 = vmatpush3.msra.mxu0 %v839_v23 }
  0xbb   : > { %2039 = vmatprep.subr.mxu0 %v2570_v0 }
  0xbc   : > { %2040 = vmatpush3.msra.mxu0 %v838_v24 }
  0xbd   : > { %2042 = vmatmul.mubr.msk.f32.vlgmr.msra.gmra.mxu0 %vm679_vm1, %v666_v10  ;;  %2064 = vmatprep.subr.mxu0 %v2570_v0 }
  0xbe   : > { %2066 = vmatprep.mubr.msk.f32.mxu0 %vm2571_vm0, %v2570_v0 }
 0x173   : > { %v749_v13 = vpop.f32.mrf.mxu0  ;;  %v834_v14 = vpop.f32.mrf.mxu1 }
 0x174   : > { %v750_v15 = vadd.f32 %v1949_v11, %v749_v13  ;;  %v835_v16 = vadd.f32 %v1951_v12, %v834_v14 }
 0x175   : > { %v2021_v17 = vpop.f32.mrf.mxu0  ;;  %v2032_v18 = vpop.f32.mrf.mxu1 }
 0x176   : > { %v753_v19 = vmul.f32 0.35355338, %v750_v15  ;;  %1090 = vrot.lane.b32.xlu1 %v835_v16, %s2572_s19  ;;  %2045 = vmatpush3.xpose.msk.msra.mxu1 %vm919_vm2, %v835_v16 }
 0x177   : > { %2049 = vmatprep.subr.mxu1 %v2570_v0 }
 0x179   : > { %2047 = vmatmul.mubr.msk.f32.vlgmr.msra.gmra.mxu1 %vm919_vm2, %v753_v19 }
 0x17a   : > { %1088 = vrot.lane.b32.xlu1 %v753_v19, %s2572_s19  ;;  %2051 = vmatprep.mubr.msk.f32.mxu1 %vm2571_vm0, %v2570_v0 }
 0x17d   : > { %v915_v41 = vpop.f32.mrf.mxu0 }
 0x17e   : > { %1255 = vrot.lane.b32.xlu1 %v753_v19, %s2573_s24  ;;  %v2939_v42 = vadd.f32 %v1953_v40, %v915_v41 }
 0x17f   : > { %v2043_v43 = vpop.f32.mrf.mxu0 }
 0x180   : > { %2050 = vmatpush3.msra.mxu1 %v2939_v42 }
 0x181   : > { %2054 = vmatprep.subr.mxu1 %v2570_v0 }
 0x182   : > { %1423 = vrot.lane.b32.xlu1 %v835_v16, %s2574_s25 }
 0x186   : > { %1421 = vrot.lane.b32.xlu1 %v753_v19, %s2574_s25 }
 0x1e8   : > { %v1091_v44 = vpop.permute.xlu1 %1090 }
 0x1ec   : > { %v1089_v45 = vpop.permute.xlu1 %1088 }
 0x1f0   : > { %v1256_v46 = vpop.permute.xlu1 %1255 }
 0x1f4   : > { %v1424_v49 = vpop.permute.xlu1 %1423 }
 0x1f8   : > { %v1422_v50 = vpop.permute.xlu1 %1421 }
 0x239   : > { %v992_v31 = vpop.f32.mrf.mxu1 }
 0x23a   : > { %v1003_v32 = vsel %vm1002_vm4, -1e+09, %v992_v31 }
 0x23b   : > { %v2048_v33 = vpop.f32.mrf.mxu1  ;;  %v1004_v34 = vsel %vm919_vm2, %v1003_v32, -inf }
 0x23c   : > { %1005 = vmax.xlane.f32.xlu0 %v1004_v34  ;;  %v1606_v33 = vld [vmem:[#allocation14 + $0x10] sm:$0xff]  ;;  %v1605_v34 = vld [vmem:[#allocation14 + $0x8] sm:$0xff] }
 0x2c5   : > { %v1006_v35 = vpop.xlane.xlu0 %1005 }
 0x2c6   : > { %v1007_v36 = vsub.f32 %v1003_v32, %v1006_v35  ;;  %v1607_v32 = vld [vmem:[#allocation14 + $0x18] sm:$0xff]  ;;  %v1604_v35 = vld [vmem:[#allocation14] sm:$0xff] }
 0x2c8   : > { %v1008_v37 = vmul.f32 1.442695, %v1007_v36 }
 0x2ca   : > { %2230 = vpow2.f32 %v1008_v37 }
 0x2d7   : > { %v2231_v38 = vpop.eup %2230 }
 0x2d8   : > { %v1010_v39 = vsel %vm919_vm2, %v2231_v38, 0.0 }
 0x2d9   : > { %1011 = vadd.xlane.f32.xlu0 %v1010_v39 }
 0x2ef   : > { %1257 = vrot.lane.b32.xlu0 %v835_v16, %s2573_s24 }
 0x362   : > { %v1012_v47 = vpop.xlane.xlu0 %1011 }
 0x363   : > { %2232 = vrcp.f32 %v1012_v47 }
 0x366   : > { %v1258_v48 = vpop.permute.xlu0 %1257 }
 0x367   : > { %2065 = vmatpush3.xpose.msk.msra.mxu0 %vm919_vm2, %v1258_v48 }
 0x368   : > { %2074 = vmatprep.subr.mxu0 %v2570_v0 }
 0x36a   : > { %2067 = vmatmul.mubr.msk.f32.vlgmr.msra.gmra.mxu0 %vm919_vm2, %v1256_v46 }
 0x36b   : > { %2075 = vmatpush3.xpose.msk.msra.mxu0 %vm919_vm2, %v1424_v49  ;;  %2076 = vmatprep.mubr.msk.f32.mxu0 %vm2571_vm0, %v2570_v0 }
 0x36c   : > { %2084 = vmatprep.subr.mxu0 %v2570_v0 }
 0x36e   : > { %2077 = vmatmul.mubr.msk.f32.vlgmr.msra.gmra.mxu0 %vm919_vm2, %v1422_v50 }
 0x36f   : > { %2092 = vmatprep.mubr.msk.f32.mxu0 %vm2571_vm0, %v2570_v0  ;;  %2085 = vmatpush3.msra.mxu0 %v1607_v32 }
 0x370   : > { %v2233_v51 = vpop.eup %2232  ;;  %2086 = vmatprep.subr.mxu0 %v2570_v0 }
 0x371   : > { %v1014_v52 = vmul.f32 %v2233_v51, %v2231_v38  ;;  %2087 = vmatpush3.msra.mxu0 %v1606_v33 }
 0x372   : > { %2088 = vmatprep.subr.mxu0 %v2570_v0 }
 0x373   : > { %2052 = vmatmul.mubr.msk.f32.vlgmr.msra.gmra.mxu1 %vm919_vm2, %v1014_v52  ;;  %2089 = vmatpush3.msra.mxu0 %v1605_v34 }
 0x374   : > { %2055 = vmatpush3.xpose.msk.msra.mxu1 %vm919_vm2, %v1091_v44  ;;  %2056 = vmatprep.mubr.msk.f32.mxu1 %vm2571_vm0, %v2570_v0 }
 0x375   : > { %2059 = vmatprep.subr.mxu1 %v2570_v0  ;;  %2090 = vmatprep.subr.mxu0 %v2570_v0 }
 0x376   : > { %2091 = vmatpush3.msra.mxu0 %v1604_v35 }
 0x377   : > { %2057 = vmatmul.mubr.msk.f32.vlgmr.msra.gmra.mxu1 %vm919_vm2, %v1089_v45 }
 0x378   : > { %2061 = vmatprep.mubr.msk.f32.mxu1 %vm2571_vm0, %v2570_v0 }
 0x42a   : > { %v1329_v53 = vpop.f32.mrf.mxu0 }
 0x42b   : > { %v1333_v54 = vsel %vm1002_vm4, -1e+09, %v1329_v53 }
 0x42c   : > { %v2068_v55 = vpop.f32.mrf.mxu0  ;;  %v1334_v56 = vsel %vm919_vm2, %v1333_v54, -inf }
 0x42d   : > { %1335 = vmax.xlane.f32.xlu0 %v1334_v56 }
 0x42e   : > { %v1495_v57 = vpop.f32.mrf.mxu0 }
 0x42f   : > { %v1499_v2 = vsel %vm1002_vm4, -1e+09, %v1495_v57 }
 0x430   : > { %v2078_v58 = vpop.f32.mrf.mxu0  ;;  %v1500_v3 = vsel %vm919_vm2, %v1499_v2, -inf }
 0x433   : > { %v2964_v59 = vpop.f32.mrf.mxu1 }
 0x435   : > { %v2053_v60 = vpop.f32.mrf.mxu1 }
 0x437   : > { %v1162_v61 = vpop.f32.mrf.mxu1 }
 0x438   : > { %v1166_v62 = vsel %vm1002_vm4, -1e+09, %v1162_v61 }
 0x439   : > { %v2058_v63 = vpop.f32.mrf.mxu1  ;;  %v1167_v1 = vsel %vm919_vm2, %v1166_v62, -inf }
 0x43a   : > { %1168 = vmax.xlane.f32.xlu1 %v1167_v1 }
 0x43e   : > { %1501 = vmax.xlane.f32.xlu1 %v1500_v3 }
 0x4b6   : > { %v1336_v4 = vpop.xlane.xlu0 %1335 }
 0x4b7   : > { %v1337_v5 = vsub.f32 %v1333_v54, %v1336_v4 }
 0x4b9   : > { %v1338_v6 = vmul.f32 1.442695, %v1337_v5 }
 0x4bb   : > { %2234 = vpow2.f32 %v1338_v6 }
 0x4c3   : > { %v1169_v7 = vpop.xlane.xlu1 %1168 }
 0x4c4   : > { %v1170_v16 = vsub.f32 %v1166_v62, %v1169_v7  ;;  %v1969_v62 = vld [vmem:[%s3124_s13] ss:$0 sm:$0xff] }
 0x4c6   : > { %v1171_v17 = vmul.f32 1.442695, %v1170_v16 }
 0x4c7   : > { %v1502_v8 = vpop.xlane.xlu1 %1501 }
 0x4c8   : > { %v2235_v10 = vpop.eup %2234  ;;  %v1503_v11 = vsub.f32 %v1499_v2, %v1502_v8 }
 0x4c9   : > { %v1340_v12 = vsel %vm919_vm2, %v2235_v10, 0.0 }
 0x4ca   : > { %v1504_v13 = vmul.f32 1.442695, %v1503_v11  ;;  %1341 = vadd.xlane.f32.xlu0 %v1340_v12 }
 0x4cc   : > { %2236 = vpow2.f32 %v1504_v13 }
 0x4cd   : > { %2238 = vpow2.f32 %v1171_v17 }
 0x4d9   : > { %v2237_v14 = vpop.eup %2236 }
 0x4da   : > { %v1506_v15 = vsel %vm919_vm2, %v2237_v14, 0.0  ;;  %v2239_v18 = vpop.eup %2238 }
 0x4db   : > { %1507 = vadd.xlane.f32.xlu1 %v1506_v15  ;;  %v1173_v19 = vsel %vm919_vm2, %v2239_v18, 0.0 }
 0x4e0   : > { %1179 = vrot.lane.b32.xlu0 %v2939_v42, %s2572_s19  ;;  %s3122_s19 = sld [smem:[#allocation33_spill]] }
 0x4e6   : > { %v1967_v47 = vld [vmem:[%s3122_s19] ss:$0 sm:$0xff] }
 0x4ec   : > { %1345 = vrot.lane.b32.xlu1 %v2939_v42, %s2573_s24  ;;  %s659_s24 = scalar_select %p658_p10, %s2550_s16, 1 }
 0x510   : > { %1174 = vadd.xlane.f32.xlu1 %v1173_v19 }
 0x521   : > { %1511 = vrot.lane.b32.xlu1 %v2939_v42, %s2574_s25  ;;  %s1948_s25 = sshll.u32 %s659_s24, 3  ;;  %s3127_s24 = sld [smem:[#allocation36_spill]] }
 0x522   : > { %s664_s18 = scalar_lea.vmem %s3123_s26, %s1948_s25  ;;  %s2579_s26 = smov [#allocation16]  }
 0x553   : > { %v1342_v20 = vpop.xlane.xlu0 %1341 }
 0x557   : > { %v1180_v21 = vpop.permute.xlu0 %1179 }
 0x558   : > { %2060 = vmatpush3.msra.mxu1 %v1180_v21 }
 0x559   : > { %2069 = vmatprep.subr.mxu1 %v2570_v0 }
 0x564   : > { %v1508_v22 = vpop.xlane.xlu1 %1507 }
 0x568   : > { %v1346_v23 = vpop.permute.xlu1 %1345 }
 0x599   : > { %v1175_v24 = vpop.xlane.xlu1 %1174 }
 0x59a   : > { %2240 = vrcp.f32 %v1175_v24 }
 0x59b   : > { %2242 = vrcp.f32 %v1342_v20 }
 0x59c   : > { %2244 = vrcp.f32 %v1508_v22 }
 0x59d   : > { %v1512_v30 = vpop.permute.xlu1 %1511 }
 0x5a7   : > { %v2241_v25 = vpop.eup %2240 }
 0x5a8   : > { %v1177_v26 = vmul.f32 %v2241_v25, %v2239_v18  ;;  %v2243_v27 = vpop.eup %2242 }
 0x5a9   : > { %v1344_v28 = vmul.f32 %v2243_v27, %v2235_v10  ;;  %v2245_v29 = vpop.eup %2244 }
 0x5aa   : > { %2062 = vmatmul.mubr.msk.f32.vlgmr.msra.gmra.mxu1 %vm919_vm2, %v1177_v26  ;;  %v1510_v31 = vmul.f32 %v2245_v29, %v2237_v14 }
 0x5ab   : > { %2070 = vmatpush3.msra.mxu1 %v1346_v23  ;;  %2071 = vmatprep.mubr.msk.f32.mxu1 %vm2571_vm0, %v2570_v0 }
 0x5ac   : > { %2079 = vmatprep.subr.mxu1 %v2570_v0 }
 0x5ae   : > { %2072 = vmatmul.mubr.msk.f32.vlgmr.msra.gmra.mxu1 %vm919_vm2, %v1344_v28 }
 0x5af   : > { %2080 = vmatpush3.msra.mxu1 %v1512_v30  ;;  %2081 = vmatprep.mubr.msk.f32.mxu1 %vm2571_vm0, %v2570_v0 }
 0x5b2   : > { %2082 = vmatmul.mubr.msk.f32.vlgmr.msra.gmra.mxu1 %vm919_vm2, %v1510_v31 }
 0x66a   : > { %v1251_v36 = vpop.f32.mrf.mxu1 }
 0x66b   : > { %1588 = vrot.lane.b32.xlu0 %v1251_v36, %s2576_s23  ;;  %s3126_s23 = sld [smem:[#allocation35_spill]] }
 0x66c   : > { %v2063_v37 = vpop.f32.mrf.mxu1 }
 0x66e   : > { %v1417_v38 = vpop.f32.mrf.mxu1 }
 0x66f   : > { %1592 = vrot.lane.b32.xlu1 %v1417_v38, %s2577_s20  ;;  %s1972_s20 = sshll.u32 %s2550_s16, 7 }
 0x670   : > { %v2073_v39 = vpop.f32.mrf.mxu1  ;;  %s1740_s25 = scalar_lea.hbm %s3127_s24, %s1972_s20 }
 0x671   : > { %v1970_v1 = vld [vmem:[%s3126_s23] ss:$0 sm:$0xff] }
 0x672   : > { %v1583_v40 = vpop.f32.mrf.mxu1 }
 0x673   : > { %1596 = vrot.lane.b32.xlu0 %v1583_v40, %s2578_s14  ;;  %s657_s14 = scalar_lea.vmem [#allocation16], %s2848_s21 }
 0x674   : > { %v2083_v41 = vpop.f32.mrf.mxu1  ;;  %s1742_s27 = sshll.u32 %s657_s14, 4  ;;  %s1743_s27 = int_to_ptr.vmem [resolvable:$true] %s1742_s27 }
 0x675   : > { %s2462_s11 = scalar_lea.vmem %s1743_s27, 128 }
 0x676   : > { %p2463_p11 = scmp.ne.s32.totalorder %s1743_s27, %s2462_s11 }
 0x678   : > { %p2464_p7 = pnand %p2463_p11, %p3128_p3 }
 0x67a   : > { %p2465_p13 = pneg %p2464_p7 }
 0x6dd   : > { %v1589_v42 = vpop.permute.xlu0 %1588 }
 0x6de   : > { %v1599_v0 = vsel %vm919_vm2, %v2964_v59, %v1589_v42 }
 0x6e1   : > { %v1593_v43 = vpop.permute.xlu1 %1592 }
 0x6e2   : > { %v1601_v44 = vsel %vm1600_vm5, %v1599_v0, %v1593_v43 }
 0x6e5   : > { %v1597_v45 = vpop.permute.xlu0 %1596 }
 0x6e6   : > { %v1603_v46 = vsel %vm1602_vm6, %v1601_v44, %v1597_v45 }
 0x6e7   : > { %2093 = vmatmul.mubr.msk.f32.vlgmr.msra.gmra.mxu0 %vm679_vm1, %v1603_v46 }
 0x7a7   : > { %v1684_v48 = vpop.f32.mrf.mxu0 }
 0x7a8   : > { %v1685_v49 = vadd.f32 %v1967_v47, %v1684_v48 }
 0x7a9   : > { %v2094_v50 = vpop.f32.mrf.mxu0 }
 0x7aa   : > { %v1688_v51 = vadd.f32 %v1685_v49, %v2887_v9  ;;  %v1719_v9 = vld [vmem:[%s664_s18] sm:$0xff]  ;;  %s2466_s18 = sshll.u32 %s2579_s26, 4  ;;  %s2467_s18 = int_to_ptr.vmem [resolvable:$false] %s2466_s18 }
 0x7ab   : > { %s2468_s16 = scalar_lea.vmem %s2467_s18, 256  ;;  %p2469_p5 = scmp.lt.s32.totalorder %s1743_s27, %s2467_s18 }
 0x7ac   : > { %v1689_v52 = vsel %vm679_vm1, %v1688_v51, 0.0  ;;  %p2470_p4 = scmp.lt.s32.totalorder %s2468_s16, %s2462_s11 }
 0x7ad   : > { %1690 = vadd.xlane.f32.xlu1 %v1689_v52 }
 0x7ae   : > { %p2471_p6 = por %p2470_p4, %p2469_p5 }
 0x7b0   : > { %p2472_p1 = pnand %p2471_p6, %p2465_p13 }
 0x836   : > { %v1691_v53 = vpop.xlane.xlu1 %1690 }
 0x837   : > { %v1693_v54 = vmul.f32 0.03125, %v1691_v53 }
 0x839   : > { %v1694_v55 = vsub.f32 %v1688_v51, %v1693_v54 }
 0x83b   : > { %v1695_v56 = vmul.f32 %v1694_v55, %v1694_v55 }
 0x83d   : > { %v1696_v57 = vsel %vm679_vm1, %v1695_v56, 0.0 }
 0x83e   : > { %1697 = vadd.xlane.f32.xlu0 %v1696_v57 }
 0x854   : > { %1722 = vperm.xlu0 %2229, %v1719_v9  }
 0x8c7   : > { %v1698_v58 = vpop.xlane.xlu0 %1697 }
 0x8c8   : > { %v1699_v59 = vmul.f32 0.03125, %v1698_v58 }
 0x8ca   : > { %v1700_v60 = vadd.f32 1e-06, %v1699_v59 }
 0x8cc   : > { %2246 = vrsqrt.f32 %v1700_v60 }
 0x8cf   : > { %v1723_v3 = vpop.permute.xlu0 %1722 }
 0x8d9   : > { %v2247_v61 = vpop.eup %2246 }
 0x8da   : > { %v1702_v63 = vmul.f32 %v2247_v61, %v1694_v55 }
 0x8dc   : > { %v1710_v2 = vmul.f32 %v1969_v62, %v1702_v63 }
 0x8de   : > { %v1718_v4 = vadd.f32 %v1970_v1, %v1710_v2 }
 0x8e0   : > { %v1725_v5 = vmul.f32 %v1723_v3, %v1718_v4 }
 0x8e2   : > { %1726 = vst.msk [vmem:[%s657_s14] sm:$0xff] %vm679_vm1, %v1725_v5 }
 0x8e3   : > { %2475 = shalt.err (!%p2472_p1)
}
 0x8e4   : > { %s2476_s21 = scalar_lea.hbm %s1740_s25, 128  ;;  %s2480_s12 = scalar_lea.hbm %s3127_s24, 256 }
 0x8e5   : > { %p2477_p12 = scmp.ne.s32.totalorder %s1740_s25, %s2476_s21  ;;  %p2481_p8 = scmp.lt.s32.totalorder %s1740_s25, %s3127_s24 }
 0x8e6   : > { %p2482_p2 = scmp.lt.s32.totalorder %s2480_s12, %s2476_s21 }
 0x8e7   : > { %p2478_p0 = pnand %p2477_p12, %p3128_p3 }
 0x8e8   : > { %p2483_p10 = por %p2482_p2, %p2481_p8 }
 0x8e9   : > { %p2479_p9 = pneg %p2478_p0 }
 0x8eb   : > { %p2484_p11 = pnand %p2483_p10, %p2479_p9 }
 0x8ed   : > { %2487 = shalt.err (!%p2484_p11)
}
 0x8ee   : > { %2121 = dma.vmem_to_hbm [thread:$0]  (%p3128_p3), %s1743_s27, 128, %s1740_s25, %s1728_s3  }
 0x8ef PF: > { %s3129_s15 = sld [smem:[#allocation23_spill]] }
 0x8f0   : > { %s3130_s23 = sld [smem:[#allocation29_spill]] }
 0x8f1   : > { %s3131_s20 = sld [smem:[#allocation25_spill]] }
 0x8f5   : > { %s1754_s14 = sand.u32 1, %s3129_s15  }
 0x8f6   : > { %p3132_p7 = scmp.ne.s32.totalorder %s3130_s23, 0  ;;  %s1755_s28 = scalar_lea.sflag [#allocation4], %s1754_s14 }
 0x8f7   : > { %p3133_p13 = scmp.ge.s32.totalorder %s3131_s20, 2 }
 0x8f9   : > { %p2150_p5 = pnand %p3133_p13, %p3132_p7 }
 0x8fb   : > { %p2151_p4 = pneg %p2150_p5 }
 0x8fd   : > { %2533 = dma.done.wait (%p2151_p4), %s1755_s28, 128  }
 0x8fe   : > { %2535 = vsyncadd (%p2151_p4), %s1755_s28, 4294967168  ;;  %s36_s18 = sadd.s32 1, %s3131_s20   ;;  %s3134_s19 = sld [smem:[#allocation24_spill]] }
 0x8ff   : > { %p33_p6 = scmp.ge.s32.totalorder %s36_s18, 4   ;;  %s3135_s15 = sld [smem:[#allocation28_spill]] }
 0x900   : > { %s3136_s27 = sld [smem:[#allocation26_spill]]  ;;  %s3137_s29 = smov %s2542_s30 }
 0x901   : > { %s3139_s16 = smov %s2554_s17 }
 0x902   :  { %35 = sbr.rel (!%p33_p6) target bundleno = 19 (0x13), region = 168 }
 0x904   : > { %s3138_s30 = smov %s3134_s19 }
 0x906   : > { %s3140_s17 = smov %s3136_s27 }
 0x907   :  { %1760 = vsyncpa [#allocation3], 1 }
 0x908   :  { %1762 = vsyncpa [#allocation3 + $0x1], 1 }
 0x909   :  { %1763 = vsyncpa [#allocation6], 1 }
 0x90a   :  { %1765 = vsyncpa [#allocation6 + $0x1], 1 }
 0x90b   :  { %1766 = vsyncpa [#allocation9], 1 }
 0x90c   :  { %1767 = vsyncpa [#allocation12], 1 }
 0x90d   :  { %1768 = vsyncpa [#allocation15], 1 }
 0x90e   :  { %1769 = vsyncpa [#allocation4], 1 }
 0x90f   :  { %1771 = vsyncpa [#allocation4 + $0x1], 1 }

</bundles_post_ra>
